<compile_context>
chip_gen: v7x
topology: tpu7x:2x2x1
jax: 0.10.0
libtpu: 0.0.40
codegen_flags: <defaults>
</compile_context>

<pallas_src>
import functools
import math

import jax
import jax.numpy as jnp
from jax.experimental import pallas as pl
from jax.experimental.pallas import tpu as pltpu


def _mha_fused_kernel(q_ref, k_ref, v_ref, wqt_ref, wkt_ref, wvt_ref, o_ref, *,
                      head_num, key_dim, dim_model, seq_len, batch):
    S, B, D, H, Kd = seq_len, batch, dim_model, head_num, key_dim

    # Merge the batch into the row (sublane) axis so each projection is a
    # single (B*S, D) @ (D, H*out) MXU matmul (batch-major rows -> the later
    # per-batch slices are contiguous). Matmul operands are cast to bf16
    # (MXU-native on all gens); accumulation is f32.
    xq = jnp.concatenate([q_ref[:, b, :] for b in range(B)], axis=0).astype(jnp.bfloat16)
    xk = jnp.concatenate([k_ref[:, b, :] for b in range(B)], axis=0).astype(jnp.bfloat16)
    xv = jnp.concatenate([v_ref[:, b, :] for b in range(B)], axis=0).astype(jnp.bfloat16)

    wqt = wqt_ref[...]        # (D, H*Kd) bf16, 1/sqrt(dim_model) pre-folded
    wkt = wkt_ref[...]        # (D, H*Kd) bf16
    wvt = wvt_ref[...]        # (D, H*D)  bf16

    qp = jnp.dot(xq, wqt, preferred_element_type=jnp.float32)   # (B*S, H*Kd)
    kp = jnp.dot(xk, wkt, preferred_element_type=jnp.float32)   # (B*S, H*Kd)
    vp = jnp.dot(xv, wvt, preferred_element_type=jnp.float32)   # (B*S, H*D)

    # q @ k^T expressed as a contraction over the Kd axis (no in-kernel transpose).
    nt_dims = (((1,), (1,)), ((), ()))

    for b in range(B):              # static unroll: B, H are tiny here
        q_b = qp[b * S:(b + 1) * S, :]
        k_b = kp[b * S:(b + 1) * S, :]
        v_b = vp[b * S:(b + 1) * S, :]
        for h in range(H):
            qh = q_b[:, h * Kd:(h + 1) * Kd].astype(jnp.bfloat16)   # (S, Kd)
            kh = k_b[:, h * Kd:(h + 1) * Kd].astype(jnp.bfloat16)   # (S, Kd)
            vh = v_b[:, h * D:(h + 1) * D].astype(jnp.bfloat16)     # (S, D)

            # Scale is already folded into Wq, so no `* scale` here.
            scores = jax.lax.dot_general(
                qh, kh, dimension_numbers=nt_dims,
                preferred_element_type=jnp.float32)                 # (S, S)

            # Numerically-stable softmax in f32; denominator on the EUP.
            scores = scores - jnp.max(scores, axis=-1, keepdims=True)
            e = jnp.exp(scores)
            denom = jnp.sum(e, axis=-1, keepdims=True)
            attn = e * pl.reciprocal(denom, approx=True)

            out_h = jnp.dot(attn.astype(jnp.bfloat16), vh,
                            preferred_element_type=jnp.float32)     # (S, D)

            # Direct lane-range store into the (S, B, H*D) output slab: no
            # per-head concatenate / output relayout.
            o_ref[:, b, h * D:(h + 1) * D] = out_h.astype(o_ref.dtype)


@jax.jit
def multi_head_attention_pallas(query, key, value, wq, wk, wv):
    """query/key/value: (S, B, D) float32.
    wq, wk: (H, Kd, D); wv: (H, D, D)  (torch nn.Linear weight layout, no bias).
    returns: (S, B, H * D) float32."""
    S, B, D = query.shape
    H, Kd, _ = wq.shape
    # The reference module divides by np.sqrt(embed_dim) == sqrt(dim_model)
    # (not the conventional sqrt(key_dim)); we match the module.
    scale = 1.0 / math.sqrt(float(D))

    # One-time weight plumbing (fuses with the bf16 cast under jit): stack the
    # heads, pre-transpose to (D, H*out) so column block h is W[h]^T, and fold
    # the softmax scale into Wq so the kernel never multiplies the scores.
    wq_t = (jnp.transpose(wq.reshape(H * Kd, D)) * scale).astype(jnp.bfloat16)
    wk_t = jnp.transpose(wk.reshape(H * Kd, D)).astype(jnp.bfloat16)
    wv_t = jnp.transpose(wv.reshape(H * D, D)).astype(jnp.bfloat16)

    proj_flops = 2 * B * S * D * (2 * H * Kd + H * D)
    attn_flops = 2 * B * H * S * S * (Kd + D)
    bytes_accessed = (3 * S * B * D * 4                       # q, k, v (f32 in)
                      + 2 * D * H * Kd * 2 + D * H * D * 2    # bf16 weights
                      + S * B * H * D * 4)                    # f32 out

    kernel = functools.partial(
        _mha_fused_kernel, head_num=H, key_dim=Kd, dim_model=D,
        seq_len=S, batch=B)

    # Single grid step: everything (<~32 KiB) fits in VMEM, q/k/v stay in their
    # native (S, B, D) layout (no wrapper transpose HBM passes), and there is
    # no per-batch pipeline-step overhead.
    return pl.pallas_call(
        kernel,
        out_shape=jax.ShapeDtypeStruct((S, B, H * D), query.dtype),
        cost_estimate=pl.CostEstimate(
            flops=proj_flops + attn_flops,
            transcendentals=B * H * S * S,
            bytes_accessed=bytes_accessed),
        compiler_params=pltpu.CompilerParams(
            vmem_limit_bytes=64 * 1024 * 1024),
    )(query, key, value, wq_t, wk_t, wv_t)


def _reference(query, key, value, wq, wk, wv):
    """Pure-JAX reference of the module forward, exact f32 matmuls."""
    S, B, D = query.shape
    H = wq.shape[0]
    hp = jax.lax.Precision.HIGHEST
    scale = 1.0 / math.sqrt(float(D))
    outs = []
    for h in range(H):
        q = jnp.einsum("sbd,kd->sbk", query, wq[h], precision=hp)   # (S, B, Kd)
        k = jnp.einsum("sbd,kd->sbk", key, wk[h], precision=hp)     # (S, B, Kd)
        v = jnp.einsum("sbd,ed->sbe", value, wv[h], precision=hp)   # (S, B, D)
        scores = jnp.einsum("sbk,tbk->bst", q, k, precision=hp) * scale
        attn = jax.nn.softmax(scores, axis=-1)
        o = jnp.einsum("bst,tbd->sbd", attn, v, precision=hp)
        outs.append(o)
    return jnp.concatenate(outs, axis=-1)


if __name__ == "__main__":
    # Small shapes consistent with the module's (seq_len, batch, dim_model) layout.
    S, B, D, Kd, H = 8, 2, 32, 16, 4

    key0 = jax.random.PRNGKey(0)
    k1, k2, k3, k4, k5, k6 = jax.random.split(key0, 6)

    query = jax.random.normal(k1, (S, B, D), dtype=jnp.float32)
    keyt = jax.random.normal(k2, (S, B, D), dtype=jnp.float32)
    value = jax.random.normal(k3, (S, B, D), dtype=jnp.float32)

    # Deterministic params (nn.Linear(bias=False) weight shape = (out, in)).
    bound = 1.0 / math.sqrt(float(D))
    wq = jax.random.uniform(k4, (H, Kd, D), jnp.float32, -bound, bound)
    wk = jax.random.uniform(k5, (H, Kd, D), jnp.float32, -bound, bound)
    wv = jax.random.uniform(k6, (H, D, D), jnp.float32, -bound, bound)

    out = multi_head_attention_pallas(query, keyt, value, wq, wk, wv)
    out = jax.block_until_ready(out)

    ref = _reference(query, keyt, value, wq, wk, wv)
    assert out.shape == (S, B, H * D), out.shape

    # Tolerance reflects the kernel's bf16 MXU operands (f32 accumulation and
    # softmax) plus the EUP approximate reciprocal, compared against an exact
    # f32 (Precision.HIGHEST) reference. A semantic/layout bug would produce
    # O(1) errors, far above this band.
    max_err = float(jnp.max(jnp.abs(out - ref)))
    assert jnp.allclose(out, ref, atol=5e-2, rtol=5e-2), (
        f"mismatch vs reference (max abs err = {max_err})")

    print("KERNEL_OK")
</pallas_src>

<mosaic_0001>
module attributes {stable_mosaic.version = 11 : i64} {
  func.func @_mha_fused_kernel(%arg0: memref<8x2x32xf32, #tpu.memory_space<vmem>>, %arg1: memref<8x2x32xf32, #tpu.memory_space<vmem>>, %arg2: memref<8x2x32xf32, #tpu.memory_space<vmem>>, %arg3: memref<32x64xbf16, #tpu.memory_space<vmem>>, %arg4: memref<32x64xbf16, #tpu.memory_space<vmem>>, %arg5: memref<32x128xbf16, #tpu.memory_space<vmem>>, %arg6: memref<8x2x128xf32, #tpu.memory_space<vmem>>) attributes {dimension_semantics = [], scalar_prefetch = 0 : i64, scratch_operands = 0 : i64, tpu.core_type = #tpu.core_type<tc>} {
    %c0 = arith.constant 0 : index
    %c0_0 = arith.constant 0 : index
    %c0_1 = arith.constant 0 : index
    %0 = vector.load %arg0[%c0, %c0_0, %c0_1] : memref<8x2x32xf32, #tpu.memory_space<vmem>>, vector<8x1x32xf32>
    %1 = vector.shape_cast %0 : vector<8x1x32xf32> to vector<8x32xf32>
    %c0_2 = arith.constant 0 : index
    %c1 = arith.constant 1 : index
    %c0_3 = arith.constant 0 : index
    %2 = vector.load %arg0[%c0_2, %c1, %c0_3] : memref<8x2x32xf32, #tpu.memory_space<vmem>>, vector<8x1x32xf32>
    %3 = vector.shape_cast %2 : vector<8x1x32xf32> to vector<8x32xf32>
    %4 = tpu.concatenate %1, %3 in 0 : vector<8x32xf32>, vector<8x32xf32> -> vector<16x32xf32>
    %5 = arith.truncf %4 : vector<16x32xf32> to vector<16x32xbf16>
    %c0_4 = arith.constant 0 : index
    %c0_5 = arith.constant 0 : index
    %c0_6 = arith.constant 0 : index
    %6 = vector.load %arg1[%c0_4, %c0_5, %c0_6] : memref<8x2x32xf32, #tpu.memory_space<vmem>>, vector<8x1x32xf32>
    %7 = vector.shape_cast %6 : vector<8x1x32xf32> to vector<8x32xf32>
    %c0_7 = arith.constant 0 : index
    %c1_8 = arith.constant 1 : index
    %c0_9 = arith.constant 0 : index
    %8 = vector.load %arg1[%c0_7, %c1_8, %c0_9] : memref<8x2x32xf32, #tpu.memory_space<vmem>>, vector<8x1x32xf32>
    %9 = vector.shape_cast %8 : vector<8x1x32xf32> to vector<8x32xf32>
    %10 = tpu.concatenate %7, %9 in 0 : vector<8x32xf32>, vector<8x32xf32> -> vector<16x32xf32>
    %11 = arith.truncf %10 : vector<16x32xf32> to vector<16x32xbf16>
    %c0_10 = arith.constant 0 : index
    %c0_11 = arith.constant 0 : index
    %c0_12 = arith.constant 0 : index
    %12 = vector.load %arg2[%c0_10, %c0_11, %c0_12] : memref<8x2x32xf32, #tpu.memory_space<vmem>>, vector<8x1x32xf32>
    %13 = vector.shape_cast %12 : vector<8x1x32xf32> to vector<8x32xf32>
    %c0_13 = arith.constant 0 : index
    %c1_14 = arith.constant 1 : index
    %c0_15 = arith.constant 0 : index
    %14 = vector.load %arg2[%c0_13, %c1_14, %c0_15] : memref<8x2x32xf32, #tpu.memory_space<vmem>>, vector<8x1x32xf32>
    %15 = vector.shape_cast %14 : vector<8x1x32xf32> to vector<8x32xf32>
    %16 = tpu.concatenate %13, %15 in 0 : vector<8x32xf32>, vector<8x32xf32> -> vector<16x32xf32>
    %17 = arith.truncf %16 : vector<16x32xf32> to vector<16x32xbf16>
    %c0_16 = arith.constant 0 : index
    %c0_17 = arith.constant 0 : index
    %18 = vector.load %arg3[%c0_16, %c0_17] : memref<32x64xbf16, #tpu.memory_space<vmem>>, vector<32x64xbf16>
    %c0_18 = arith.constant 0 : index
    %c0_19 = arith.constant 0 : index
    %19 = vector.load %arg4[%c0_18, %c0_19] : memref<32x64xbf16, #tpu.memory_space<vmem>>, vector<32x64xbf16>
    %c0_20 = arith.constant 0 : index
    %c0_21 = arith.constant 0 : index
    %20 = vector.load %arg5[%c0_20, %c0_21] : memref<32x128xbf16, #tpu.memory_space<vmem>>, vector<32x128xbf16>
    %cst = arith.constant dense<0.000000e+00> : vector<16x64xf32>
    %21 = tpu.matmul %5, %18, %cst {dimension_numbers = #tpu.dot_dimension_numbers<[1], [0], [0], [1], [0, 0, 1, 1], [], []>} : vector<16x32xbf16>, vector<32x64xbf16>, vector<16x64xf32> -> vector<16x64xf32>
    %cst_22 = arith.constant dense<0.000000e+00> : vector<16x64xf32>
    %22 = tpu.matmul %11, %19, %cst_22 {dimension_numbers = #tpu.dot_dimension_numbers<[1], [0], [0], [1], [0, 0, 1, 1], [], []>} : vector<16x32xbf16>, vector<32x64xbf16>, vector<16x64xf32> -> vector<16x64xf32>
    %cst_23 = arith.constant dense<0.000000e+00> : vector<16x128xf32>
    %23 = tpu.matmul %17, %20, %cst_23 {dimension_numbers = #tpu.dot_dimension_numbers<[1], [0], [0], [1], [0, 0, 1, 1], [], []>} : vector<16x32xbf16>, vector<32x128xbf16>, vector<16x128xf32> -> vector<16x128xf32>
    %24 = vector.extract_strided_slice %21 {offsets = [0, 0], sizes = [8, 64], strides = [1, 1]} : vector<16x64xf32> to vector<8x64xf32>
    %25 = vector.extract_strided_slice %22 {offsets = [0, 0], sizes = [8, 64], strides = [1, 1]} : vector<16x64xf32> to vector<8x64xf32>
    %26 = vector.extract_strided_slice %23 {offsets = [0, 0], sizes = [8, 128], strides = [1, 1]} : vector<16x128xf32> to vector<8x128xf32>
    %27 = vector.extract_strided_slice %24 {offsets = [0, 0], sizes = [8, 16], strides = [1, 1]} : vector<8x64xf32> to vector<8x16xf32>
    %28 = arith.truncf %27 : vector<8x16xf32> to vector<8x16xbf16>
    %29 = vector.extract_strided_slice %25 {offsets = [0, 0], sizes = [8, 16], strides = [1, 1]} : vector<8x64xf32> to vector<8x16xf32>
    %30 = arith.truncf %29 : vector<8x16xf32> to vector<8x16xbf16>
    %31 = vector.extract_strided_slice %26 {offsets = [0, 0], sizes = [8, 32], strides = [1, 1]} : vector<8x128xf32> to vector<8x32xf32>
    %32 = arith.truncf %31 : vector<8x32xf32> to vector<8x32xbf16>
    %cst_24 = arith.constant dense<0.000000e+00> : vector<8x8xf32>
    %33 = tpu.matmul %28, %30, %cst_24 {dimension_numbers = #tpu.dot_dimension_numbers<[1], [1], [0], [0], [0, 0, 1, 0], [], []>} : vector<8x16xbf16>, vector<8x16xbf16>, vector<8x8xf32> -> vector<8x8xf32>
    %cst_25 = arith.constant dense<0xFF800000> : vector<8xf32>
    %34 = vector.multi_reduction <maximumf>, %33, %cst_25 [1] : vector<8x8xf32> to vector<8xf32>
    %35 = vector.shape_cast %34 : vector<8xf32> to vector<8x1xf32>
    %36 = vector.broadcast %35 : vector<8x1xf32> to vector<8x8xf32>
    %37 = arith.subf %33, %36 : vector<8x8xf32>
    %38 = math.exp %37 : vector<8x8xf32>
    %cst_26 = arith.constant dense<0.000000e+00> : vector<8xf32>
    %39 = vector.multi_reduction <add>, %38, %cst_26 [1] : vector<8x8xf32> to vector<8xf32>
    %40 = vector.shape_cast %39 : vector<8xf32> to vector<8x1xf32>
    %41 = tpu.reciprocal %40 {approx = true} : vector<8x1xf32> -> vector<8x1xf32>
    %42 = vector.broadcast %41 : vector<8x1xf32> to vector<8x8xf32>
    %43 = arith.mulf %38, %42 : vector<8x8xf32>
    %44 = arith.truncf %43 : vector<8x8xf32> to vector<8x8xbf16>
    %cst_27 = arith.constant dense<0.000000e+00> : vector<8x32xf32>
    %45 = tpu.matmul %44, %32, %cst_27 {dimension_numbers = #tpu.dot_dimension_numbers<[1], [0], [0], [1], [0, 0, 1, 1], [], []>} : vector<8x8xbf16>, vector<8x32xbf16>, vector<8x32xf32> -> vector<8x32xf32>
    %c0_28 = arith.constant 0 : index
    %c0_29 = arith.constant 0 : index
    %c0_30 = arith.constant 0 : index
    %46 = vector.load %arg6[%c0_28, %c0_29, %c0_30] : memref<8x2x128xf32, #tpu.memory_space<vmem>>, vector<8x1x32xf32>
    %47 = vector.shape_cast %46 : vector<8x1x32xf32> to vector<8x32xf32>
    %48 = vector.shape_cast %45 : vector<8x32xf32> to vector<8x1x32xf32>
    tpu.vector_store %arg6[%c0_28, %c0_29, %c0_30], %48 {strides = array<i32>} : memref<8x2x128xf32, #tpu.memory_space<vmem>>, vector<8x1x32xf32>,
    %49 = vector.extract_strided_slice %24 {offsets = [0, 16], sizes = [8, 16], strides = [1, 1]} : vector<8x64xf32> to vector<8x16xf32>
    %50 = arith.truncf %49 : vector<8x16xf32> to vector<8x16xbf16>
    %51 = vector.extract_strided_slice %25 {offsets = [0, 16], sizes = [8, 16], strides = [1, 1]} : vector<8x64xf32> to vector<8x16xf32>
    %52 = arith.truncf %51 : vector<8x16xf32> to vector<8x16xbf16>
    %53 = vector.extract_strided_slice %26 {offsets = [0, 32], sizes = [8, 32], strides = [1, 1]} : vector<8x128xf32> to vector<8x32xf32>
    %54 = arith.truncf %53 : vector<8x32xf32> to vector<8x32xbf16>
    %cst_31 = arith.constant dense<0.000000e+00> : vector<8x8xf32>
    %55 = tpu.matmul %50, %52, %cst_31 {dimension_numbers = #tpu.dot_dimension_numbers<[1], [1], [0], [0], [0, 0, 1, 0], [], []>} : vector<8x16xbf16>, vector<8x16xbf16>, vector<8x8xf32> -> vector<8x8xf32>
    %cst_32 = arith.constant dense<0xFF800000> : vector<8xf32>
    %56 = vector.multi_reduction <maximumf>, %55, %cst_32 [1] : vector<8x8xf32> to vector<8xf32>
    %57 = vector.shape_cast %56 : vector<8xf32> to vector<8x1xf32>
    %58 = vector.broadcast %57 : vector<8x1xf32> to vector<8x8xf32>
    %59 = arith.subf %55, %58 : vector<8x8xf32>
    %60 = math.exp %59 : vector<8x8xf32>
    %cst_33 = arith.constant dense<0.000000e+00> : vector<8xf32>
    %61 = vector.multi_reduction <add>, %60, %cst_33 [1] : vector<8x8xf32> to vector<8xf32>
    %62 = vector.shape_cast %61 : vector<8xf32> to vector<8x1xf32>
    %63 = tpu.reciprocal %62 {approx = true} : vector<8x1xf32> -> vector<8x1xf32>
    %64 = vector.broadcast %63 : vector<8x1xf32> to vector<8x8xf32>
    %65 = arith.mulf %60, %64 : vector<8x8xf32>
    %66 = arith.truncf %65 : vector<8x8xf32> to vector<8x8xbf16>
    %cst_34 = arith.constant dense<0.000000e+00> : vector<8x32xf32>
    %67 = tpu.matmul %66, %54, %cst_34 {dimension_numbers = #tpu.dot_dimension_numbers<[1], [0], [0], [1], [0, 0, 1, 1], [], []>} : vector<8x8xbf16>, vector<8x32xbf16>, vector<8x32xf32> -> vector<8x32xf32>
    %c0_35 = arith.constant 0 : index
    %c0_36 = arith.constant 0 : index
    %c32 = arith.constant 32 : index
    %68 = vector.load %arg6[%c0_35, %c0_36, %c32] : memref<8x2x128xf32, #tpu.memory_space<vmem>>, vector<8x1x32xf32>
    %69 = vector.shape_cast %68 : vector<8x1x32xf32> to vector<8x32xf32>
    %70 = vector.shape_cast %67 : vector<8x32xf32> to vector<8x1x32xf32>
    tpu.vector_store %arg6[%c0_35, %c0_36, %c32], %70 {strides = array<i32>} : memref<8x2x128xf32, #tpu.memory_space<vmem>>, vector<8x1x32xf32>,
    %71 = vector.extract_strided_slice %24 {offsets = [0, 32], sizes = [8, 16], strides = [1, 1]} : vector<8x64xf32> to vector<8x16xf32>
    %72 = arith.truncf %71 : vector<8x16xf32> to vector<8x16xbf16>
    %73 = vector.extract_strided_slice %25 {offsets = [0, 32], sizes = [8, 16], strides = [1, 1]} : vector<8x64xf32> to vector<8x16xf32>
    %74 = arith.truncf %73 : vector<8x16xf32> to vector<8x16xbf16>
    %75 = vector.extract_strided_slice %26 {offsets = [0, 64], sizes = [8, 32], strides = [1, 1]} : vector<8x128xf32> to vector<8x32xf32>
    %76 = arith.truncf %75 : vector<8x32xf32> to vector<8x32xbf16>
    %cst_37 = arith.constant dense<0.000000e+00> : vector<8x8xf32>
    %77 = tpu.matmul %72, %74, %cst_37 {dimension_numbers = #tpu.dot_dimension_numbers<[1], [1], [0], [0], [0, 0, 1, 0], [], []>} : vector<8x16xbf16>, vector<8x16xbf16>, vector<8x8xf32> -> vector<8x8xf32>
    %cst_38 = arith.constant dense<0xFF800000> : vector<8xf32>
    %78 = vector.multi_reduction <maximumf>, %77, %cst_38 [1] : vector<8x8xf32> to vector<8xf32>
    %79 = vector.shape_cast %78 : vector<8xf32> to vector<8x1xf32>
    %80 = vector.broadcast %79 : vector<8x1xf32> to vector<8x8xf32>
    %81 = arith.subf %77, %80 : vector<8x8xf32>
    %82 = math.exp %81 : vector<8x8xf32>
    %cst_39 = arith.constant dense<0.000000e+00> : vector<8xf32>
    %83 = vector.multi_reduction <add>, %82, %cst_39 [1] : vector<8x8xf32> to vector<8xf32>
    %84 = vector.shape_cast %83 : vector<8xf32> to vector<8x1xf32>
    %85 = tpu.reciprocal %84 {approx = true} : vector<8x1xf32> -> vector<8x1xf32>
    %86 = vector.broadcast %85 : vector<8x1xf32> to vector<8x8xf32>
    %87 = arith.mulf %82, %86 : vector<8x8xf32>
    %88 = arith.truncf %87 : vector<8x8xf32> to vector<8x8xbf16>
    %cst_40 = arith.constant dense<0.000000e+00> : vector<8x32xf32>
    %89 = tpu.matmul %88, %76, %cst_40 {dimension_numbers = #tpu.dot_dimension_numbers<[1], [0], [0], [1], [0, 0, 1, 1], [], []>} : vector<8x8xbf16>, vector<8x32xbf16>, vector<8x32xf32> -> vector<8x32xf32>
    %c0_41 = arith.constant 0 : index
    %c0_42 = arith.constant 0 : index
    %c64 = arith.constant 64 : index
    %90 = vector.load %arg6[%c0_41, %c0_42, %c64] : memref<8x2x128xf32, #tpu.memory_space<vmem>>, vector<8x1x32xf32>
    %91 = vector.shape_cast %90 : vector<8x1x32xf32> to vector<8x32xf32>
    %92 = vector.shape_cast %89 : vector<8x32xf32> to vector<8x1x32xf32>
    tpu.vector_store %arg6[%c0_41, %c0_42, %c64], %92 {strides = array<i32>} : memref<8x2x128xf32, #tpu.memory_space<vmem>>, vector<8x1x32xf32>,
    %93 = vector.extract_strided_slice %24 {offsets = [0, 48], sizes = [8, 16], strides = [1, 1]} : vector<8x64xf32> to vector<8x16xf32>
    %94 = arith.truncf %93 : vector<8x16xf32> to vector<8x16xbf16>
    %95 = vector.extract_strided_slice %25 {offsets = [0, 48], sizes = [8, 16], strides = [1, 1]} : vector<8x64xf32> to vector<8x16xf32>
    %96 = arith.truncf %95 : vector<8x16xf32> to vector<8x16xbf16>
    %97 = vector.extract_strided_slice %26 {offsets = [0, 96], sizes = [8, 32], strides = [1, 1]} : vector<8x128xf32> to vector<8x32xf32>
    %98 = arith.truncf %97 : vector<8x32xf32> to vector<8x32xbf16>
    %cst_43 = arith.constant dense<0.000000e+00> : vector<8x8xf32>
    %99 = tpu.matmul %94, %96, %cst_43 {dimension_numbers = #tpu.dot_dimension_numbers<[1], [1], [0], [0], [0, 0, 1, 0], [], []>} : vector<8x16xbf16>, vector<8x16xbf16>, vector<8x8xf32> -> vector<8x8xf32>
    %cst_44 = arith.constant dense<0xFF800000> : vector<8xf32>
    %100 = vector.multi_reduction <maximumf>, %99, %cst_44 [1] : vector<8x8xf32> to vector<8xf32>
    %101 = vector.shape_cast %100 : vector<8xf32> to vector<8x1xf32>
    %102 = vector.broadcast %101 : vector<8x1xf32> to vector<8x8xf32>
    %103 = arith.subf %99, %102 : vector<8x8xf32>
    %104 = math.exp %103 : vector<8x8xf32>
    %cst_45 = arith.constant dense<0.000000e+00> : vector<8xf32>
    %105 = vector.multi_reduction <add>, %104, %cst_45 [1] : vector<8x8xf32> to vector<8xf32>
    %106 = vector.shape_cast %105 : vector<8xf32> to vector<8x1xf32>
    %107 = tpu.reciprocal %106 {approx = true} : vector<8x1xf32> -> vector<8x1xf32>
    %108 = vector.broadcast %107 : vector<8x1xf32> to vector<8x8xf32>
    %109 = arith.mulf %104, %108 : vector<8x8xf32>
    %110 = arith.truncf %109 : vector<8x8xf32> to vector<8x8xbf16>
    %cst_46 = arith.constant dense<0.000000e+00> : vector<8x32xf32>
    %111 = tpu.matmul %110, %98, %cst_46 {dimension_numbers = #tpu.dot_dimension_numbers<[1], [0], [0], [1], [0, 0, 1, 1], [], []>} : vector<8x8xbf16>, vector<8x32xbf16>, vector<8x32xf32> -> vector<8x32xf32>
    %c0_47 = arith.constant 0 : index
    %c0_48 = arith.constant 0 : index
    %c96 = arith.constant 96 : index
    %112 = vector.load %arg6[%c0_47, %c0_48, %c96] : memref<8x2x128xf32, #tpu.memory_space<vmem>>, vector<8x1x32xf32>
    %113 = vector.shape_cast %112 : vector<8x1x32xf32> to vector<8x32xf32>
    %114 = vector.shape_cast %111 : vector<8x32xf32> to vector<8x1x32xf32>
    tpu.vector_store %arg6[%c0_47, %c0_48, %c96], %114 {strides = array<i32>} : memref<8x2x128xf32, #tpu.memory_space<vmem>>, vector<8x1x32xf32>,
    %115 = vector.extract_strided_slice %21 {offsets = [8, 0], sizes = [8, 64], strides = [1, 1]} : vector<16x64xf32> to vector<8x64xf32>
    %116 = vector.extract_strided_slice %22 {offsets = [8, 0], sizes = [8, 64], strides = [1, 1]} : vector<16x64xf32> to vector<8x64xf32>
    %117 = vector.extract_strided_slice %23 {offsets = [8, 0], sizes = [8, 128], strides = [1, 1]} : vector<16x128xf32> to vector<8x128xf32>
    %118 = vector.extract_strided_slice %115 {offsets = [0, 0], sizes = [8, 16], strides = [1, 1]} : vector<8x64xf32> to vector<8x16xf32>
    %119 = arith.truncf %118 : vector<8x16xf32> to vector<8x16xbf16>
    %120 = vector.extract_strided_slice %116 {offsets = [0, 0], sizes = [8, 16], strides = [1, 1]} : vector<8x64xf32> to vector<8x16xf32>
    %121 = arith.truncf %120 : vector<8x16xf32> to vector<8x16xbf16>
    %122 = vector.extract_strided_slice %117 {offsets = [0, 0], sizes = [8, 32], strides = [1, 1]} : vector<8x128xf32> to vector<8x32xf32>
    %123 = arith.truncf %122 : vector<8x32xf32> to vector<8x32xbf16>
    %cst_49 = arith.constant dense<0.000000e+00> : vector<8x8xf32>
    %124 = tpu.matmul %119, %121, %cst_49 {dimension_numbers = #tpu.dot_dimension_numbers<[1], [1], [0], [0], [0, 0, 1, 0], [], []>} : vector<8x16xbf16>, vector<8x16xbf16>, vector<8x8xf32> -> vector<8x8xf32>
    %cst_50 = arith.constant dense<0xFF800000> : vector<8xf32>
    %125 = vector.multi_reduction <maximumf>, %124, %cst_50 [1] : vector<8x8xf32> to vector<8xf32>
    %126 = vector.shape_cast %125 : vector<8xf32> to vector<8x1xf32>
    %127 = vector.broadcast %126 : vector<8x1xf32> to vector<8x8xf32>
    %128 = arith.subf %124, %127 : vector<8x8xf32>
    %129 = math.exp %128 : vector<8x8xf32>
    %cst_51 = arith.constant dense<0.000000e+00> : vector<8xf32>
    %130 = vector.multi_reduction <add>, %129, %cst_51 [1] : vector<8x8xf32> to vector<8xf32>
    %131 = vector.shape_cast %130 : vector<8xf32> to vector<8x1xf32>
    %132 = tpu.reciprocal %131 {approx = true} : vector<8x1xf32> -> vector<8x1xf32>
    %133 = vector.broadcast %132 : vector<8x1xf32> to vector<8x8xf32>
    %134 = arith.mulf %129, %133 : vector<8x8xf32>
    %135 = arith.truncf %134 : vector<8x8xf32> to vector<8x8xbf16>
    %cst_52 = arith.constant dense<0.000000e+00> : vector<8x32xf32>
    %136 = tpu.matmul %135, %123, %cst_52 {dimension_numbers = #tpu.dot_dimension_numbers<[1], [0], [0], [1], [0, 0, 1, 1], [], []>} : vector<8x8xbf16>, vector<8x32xbf16>, vector<8x32xf32> -> vector<8x32xf32>
    %c0_53 = arith.constant 0 : index
    %c1_54 = arith.constant 1 : index
    %c0_55 = arith.constant 0 : index
    %137 = vector.load %arg6[%c0_53, %c1_54, %c0_55] : memref<8x2x128xf32, #tpu.memory_space<vmem>>, vector<8x1x32xf32>
    %138 = vector.shape_cast %137 : vector<8x1x32xf32> to vector<8x32xf32>
    %139 = vector.shape_cast %136 : vector<8x32xf32> to vector<8x1x32xf32>
    tpu.vector_store %arg6[%c0_53, %c1_54, %c0_55], %139 {strides = array<i32>} : memref<8x2x128xf32, #tpu.memory_space<vmem>>, vector<8x1x32xf32>,
    %140 = vector.extract_strided_slice %115 {offsets = [0, 16], sizes = [8, 16], strides = [1, 1]} : vector<8x64xf32> to vector<8x16xf32>
    %141 = arith.truncf %140 : vector<8x16xf32> to vector<8x16xbf16>
    %142 = vector.extract_strided_slice %116 {offsets = [0, 16], sizes = [8, 16], strides = [1, 1]} : vector<8x64xf32> to vector<8x16xf32>
    %143 = arith.truncf %142 : vector<8x16xf32> to vector<8x16xbf16>
    %144 = vector.extract_strided_slice %117 {offsets = [0, 32], sizes = [8, 32], strides = [1, 1]} : vector<8x128xf32> to vector<8x32xf32>
    %145 = arith.truncf %144 : vector<8x32xf32> to vector<8x32xbf16>
    %cst_56 = arith.constant dense<0.000000e+00> : vector<8x8xf32>
    %146 = tpu.matmul %141, %143, %cst_56 {dimension_numbers = #tpu.dot_dimension_numbers<[1], [1], [0], [0], [0, 0, 1, 0], [], []>} : vector<8x16xbf16>, vector<8x16xbf16>, vector<8x8xf32> -> vector<8x8xf32>
    %cst_57 = arith.constant dense<0xFF800000> : vector<8xf32>
    %147 = vector.multi_reduction <maximumf>, %146, %cst_57 [1] : vector<8x8xf32> to vector<8xf32>
    %148 = vector.shape_cast %147 : vector<8xf32> to vector<8x1xf32>
    %149 = vector.broadcast %148 : vector<8x1xf32> to vector<8x8xf32>
    %150 = arith.subf %146, %149 : vector<8x8xf32>
    %151 = math.exp %150 : vector<8x8xf32>
    %cst_58 = arith.constant dense<0.000000e+00> : vector<8xf32>
    %152 = vector.multi_reduction <add>, %151, %cst_58 [1] : vector<8x8xf32> to vector<8xf32>
    %153 = vector.shape_cast %152 : vector<8xf32> to vector<8x1xf32>
    %154 = tpu.reciprocal %153 {approx = true} : vector<8x1xf32> -> vector<8x1xf32>
    %155 = vector.broadcast %154 : vector<8x1xf32> to vector<8x8xf32>
    %156 = arith.mulf %151, %155 : vector<8x8xf32>
    %157 = arith.truncf %156 : vector<8x8xf32> to vector<8x8xbf16>
    %cst_59 = arith.constant dense<0.000000e+00> : vector<8x32xf32>
    %158 = tpu.matmul %157, %145, %cst_59 {dimension_numbers = #tpu.dot_dimension_numbers<[1], [0], [0], [1], [0, 0, 1, 1], [], []>} : vector<8x8xbf16>, vector<8x32xbf16>, vector<8x32xf32> -> vector<8x32xf32>
    %c0_60 = arith.constant 0 : index
    %c1_61 = arith.constant 1 : index
    %c32_62 = arith.constant 32 : index
    %159 = vector.load %arg6[%c0_60, %c1_61, %c32_62] : memref<8x2x128xf32, #tpu.memory_space<vmem>>, vector<8x1x32xf32>
    %160 = vector.shape_cast %159 : vector<8x1x32xf32> to vector<8x32xf32>
    %161 = vector.shape_cast %158 : vector<8x32xf32> to vector<8x1x32xf32>
    tpu.vector_store %arg6[%c0_60, %c1_61, %c32_62], %161 {strides = array<i32>} : memref<8x2x128xf32, #tpu.memory_space<vmem>>, vector<8x1x32xf32>,
    %162 = vector.extract_strided_slice %115 {offsets = [0, 32], sizes = [8, 16], strides = [1, 1]} : vector<8x64xf32> to vector<8x16xf32>
    %163 = arith.truncf %162 : vector<8x16xf32> to vector<8x16xbf16>
    %164 = vector.extract_strided_slice %116 {offsets = [0, 32], sizes = [8, 16], strides = [1, 1]} : vector<8x64xf32> to vector<8x16xf32>
    %165 = arith.truncf %164 : vector<8x16xf32> to vector<8x16xbf16>
    %166 = vector.extract_strided_slice %117 {offsets = [0, 64], sizes = [8, 32], strides = [1, 1]} : vector<8x128xf32> to vector<8x32xf32>
    %167 = arith.truncf %166 : vector<8x32xf32> to vector<8x32xbf16>
    %cst_63 = arith.constant dense<0.000000e+00> : vector<8x8xf32>
    %168 = tpu.matmul %163, %165, %cst_63 {dimension_numbers = #tpu.dot_dimension_numbers<[1], [1], [0], [0], [0, 0, 1, 0], [], []>} : vector<8x16xbf16>, vector<8x16xbf16>, vector<8x8xf32> -> vector<8x8xf32>
    %cst_64 = arith.constant dense<0xFF800000> : vector<8xf32>
    %169 = vector.multi_reduction <maximumf>, %168, %cst_64 [1] : vector<8x8xf32> to vector<8xf32>
    %170 = vector.shape_cast %169 : vector<8xf32> to vector<8x1xf32>
    %171 = vector.broadcast %170 : vector<8x1xf32> to vector<8x8xf32>
    %172 = arith.subf %168, %171 : vector<8x8xf32>
    %173 = math.exp %172 : vector<8x8xf32>
    %cst_65 = arith.constant dense<0.000000e+00> : vector<8xf32>
    %174 = vector.multi_reduction <add>, %173, %cst_65 [1] : vector<8x8xf32> to vector<8xf32>
    %175 = vector.shape_cast %174 : vector<8xf32> to vector<8x1xf32>
    %176 = tpu.reciprocal %175 {approx = true} : vector<8x1xf32> -> vector<8x1xf32>
    %177 = vector.broadcast %176 : vector<8x1xf32> to vector<8x8xf32>
    %178 = arith.mulf %173, %177 : vector<8x8xf32>
    %179 = arith.truncf %178 : vector<8x8xf32> to vector<8x8xbf16>
    %cst_66 = arith.constant dense<0.000000e+00> : vector<8x32xf32>
    %180 = tpu.matmul %179, %167, %cst_66 {dimension_numbers = #tpu.dot_dimension_numbers<[1], [0], [0], [1], [0, 0, 1, 1], [], []>} : vector<8x8xbf16>, vector<8x32xbf16>, vector<8x32xf32> -> vector<8x32xf32>
    %c0_67 = arith.constant 0 : index
    %c1_68 = arith.constant 1 : index
    %c64_69 = arith.constant 64 : index
    %181 = vector.load %arg6[%c0_67, %c1_68, %c64_69] : memref<8x2x128xf32, #tpu.memory_space<vmem>>, vector<8x1x32xf32>
    %182 = vector.shape_cast %181 : vector<8x1x32xf32> to vector<8x32xf32>
    %183 = vector.shape_cast %180 : vector<8x32xf32> to vector<8x1x32xf32>
    tpu.vector_store %arg6[%c0_67, %c1_68, %c64_69], %183 {strides = array<i32>} : memref<8x2x128xf32, #tpu.memory_space<vmem>>, vector<8x1x32xf32>,
    %184 = vector.extract_strided_slice %115 {offsets = [0, 48], sizes = [8, 16], strides = [1, 1]} : vector<8x64xf32> to vector<8x16xf32>
    %185 = arith.truncf %184 : vector<8x16xf32> to vector<8x16xbf16>
    %186 = vector.extract_strided_slice %116 {offsets = [0, 48], sizes = [8, 16], strides = [1, 1]} : vector<8x64xf32> to vector<8x16xf32>
    %187 = arith.truncf %186 : vector<8x16xf32> to vector<8x16xbf16>
    %188 = vector.extract_strided_slice %117 {offsets = [0, 96], sizes = [8, 32], strides = [1, 1]} : vector<8x128xf32> to vector<8x32xf32>
    %189 = arith.truncf %188 : vector<8x32xf32> to vector<8x32xbf16>
    %cst_70 = arith.constant dense<0.000000e+00> : vector<8x8xf32>
    %190 = tpu.matmul %185, %187, %cst_70 {dimension_numbers = #tpu.dot_dimension_numbers<[1], [1], [0], [0], [0, 0, 1, 0], [], []>} : vector<8x16xbf16>, vector<8x16xbf16>, vector<8x8xf32> -> vector<8x8xf32>
    %cst_71 = arith.constant dense<0xFF800000> : vector<8xf32>
    %191 = vector.multi_reduction <maximumf>, %190, %cst_71 [1] : vector<8x8xf32> to vector<8xf32>
    %192 = vector.shape_cast %191 : vector<8xf32> to vector<8x1xf32>
    %193 = vector.broadcast %192 : vector<8x1xf32> to vector<8x8xf32>
    %194 = arith.subf %190, %193 : vector<8x8xf32>
    %195 = math.exp %194 : vector<8x8xf32>
    %cst_72 = arith.constant dense<0.000000e+00> : vector<8xf32>
    %196 = vector.multi_reduction <add>, %195, %cst_72 [1] : vector<8x8xf32> to vector<8xf32>
    %197 = vector.shape_cast %196 : vector<8xf32> to vector<8x1xf32>
    %198 = tpu.reciprocal %197 {approx = true} : vector<8x1xf32> -> vector<8x1xf32>
    %199 = vector.broadcast %198 : vector<8x1xf32> to vector<8x8xf32>
    %200 = arith.mulf %195, %199 : vector<8x8xf32>
    %201 = arith.truncf %200 : vector<8x8xf32> to vector<8x8xbf16>
    %cst_73 = arith.constant dense<0.000000e+00> : vector<8x32xf32>
    %202 = tpu.matmul %201, %189, %cst_73 {dimension_numbers = #tpu.dot_dimension_numbers<[1], [0], [0], [1], [0, 0, 1, 1], [], []>} : vector<8x8xbf16>, vector<8x32xbf16>, vector<8x32xf32> -> vector<8x32xf32>
    %c0_74 = arith.constant 0 : index
    %c1_75 = arith.constant 1 : index
    %c96_76 = arith.constant 96 : index
    %203 = vector.load %arg6[%c0_74, %c1_75, %c96_76] : memref<8x2x128xf32, #tpu.memory_space<vmem>>, vector<8x1x32xf32>
    %204 = vector.shape_cast %203 : vector<8x1x32xf32> to vector<8x32xf32>
    %205 = vector.shape_cast %202 : vector<8x32xf32> to vector<8x1x32xf32>
    tpu.vector_store %arg6[%c0_74, %c1_75, %c96_76], %205 {strides = array<i32>} : memref<8x2x128xf32, #tpu.memory_space<vmem>>, vector<8x1x32xf32>,
    return
  }
}

</mosaic_0001>

<bundles_post_ra>
// kernel: multi_head_attention_pallas.1
= control target key start
LH: loop header
LB: loop body
LE: loop exit
PB: predicated region body
PF: predicated region fallthrough
CT: control target
= control target key end

     0   :  { %11 = vsyncpa [#allocation3], 0  ;;  %s3213_s0 = inlined_call_operand.hbm [shape: f32[8,2,32], index: 0, kind: input, shape index: {}]   ;;  %s3214_s1 = inlined_call_operand.hbm [shape: f32[8,2,32], index: 1, kind: input, shape index: {}]   ;;  %s3215_s2 = inlined_call_operand.hbm [shape: f32[8,2,32], index: 2, kind: input, shape index: {}]   ;;  %s3216_s3 = inlined_call_operand.hbm [shape: bf16[32,64], index: 3, kind: input, shape index: {}]   ;;  %s3217_s4 = inlined_call_operand.hbm [shape: bf16[32,64], index: 4, kind: input, shape index: {}]   ;;  %s3218_s5 = inlined_call_operand.hbm [shape: bf16[32,128], index: 5, kind: input, shape index: {}]   ;;  %s3219_s6 = inlined_call_operand.hbm [shape: f32[8,2,128], index: 6, kind: output, shape index: {}]  }
   0x1   :  { %12 = vsyncpa [#allocation6], 0 }
   0x2   :  { %13 = vsyncpa [#allocation9], 0 }
   0x3   :  { %14 = vsyncpa [#allocation12], 0 }
   0x4   :  { %15 = vsyncpa [#allocation4], 0  ;;  %s2612_s21 = smov [#allocation5]   ;;  %s2613_s23 = smov [#allocation8]  }
   0x5   :  { %s33_s22 = sshll.u32 %s2612_s21, 4  ;;  %s57_s24 = sshll.u32 %s2613_s23, 4  ;;  %s34_s22 = int_to_ptr.vmem [resolvable:$true] %s33_s22  ;;  %s2664_s24 = int_to_ptr.vmem [resolvable:$true] %s57_s24 }
   0x6   :  { %s2448_s27 = scalar_lea.hbm %s3214_s1, 256 }
   0x7   :  { %p2449_p0 = scmp.ne.s32.totalorder %s3214_s1, %s2448_s27  ;;  %p2452_p1 = scmp.lt.u32.totalorder %s2448_s27, %s3214_s1 }
   0x9   :  { %p2454_p2 = pnand %p2452_p1, %p2449_p0 }
   0xb   :  { %2457 = shalt.err (!%p2454_p2)
}
   0xc   :  { %s2458_s8 = scalar_lea.vmem %s34_s22, 256  ;;  %p2463_p4 = scmp.lt.s32.totalorder %s34_s22, %s34_s22 }
   0xd   :  { %p2459_p3 = scmp.ne.s32.totalorder %s34_s22, %s2458_s8  ;;  %p2464_p5 = scmp.lt.s32.totalorder %s2458_s8, %s2458_s8 }
   0xf   :  { %p2465_p6 = por %p2464_p5, %p2463_p4 }
  0x11   :  { %p2466_p7 = pnand %p2465_p6, %p2459_p3 }
  0x13   :  { %2469 = shalt.err (!%p2466_p7)
}
  0x14   :  { %s2614_s9 = smov 32   ;;  %s2615_s10 = smov 2  }
  0x15   :  { %39 = dma.hbm_to_vmem [thread:$0]  %s3214_s1, 256, %s34_s22, [#allocation6], %s2614_s9, %s2614_s9, %s2615_s10  }
  0x16   :  { %s2470_s15 = scalar_lea.hbm %s3216_s3, 256 }
  0x17   :  { %p2471_p8 = scmp.ne.s32.totalorder %s3216_s3, %s2470_s15  ;;  %p2474_p9 = scmp.lt.u32.totalorder %s2470_s15, %s3216_s3 }
  0x19   :  { %p2476_p10 = pnand %p2474_p9, %p2471_p8 }
  0x1b   :  { %2479 = shalt.err (!%p2476_p10)
}
  0x1c   :  { %s2480_s20 = scalar_lea.vmem %s2664_s24, 256  ;;  %p2485_p12 = scmp.lt.s32.totalorder %s2664_s24, %s2664_s24 }
  0x1d   :  { %p2481_p11 = scmp.ne.s32.totalorder %s2664_s24, %s2480_s20  ;;  %p2486_p13 = scmp.lt.s32.totalorder %s2480_s20, %s2480_s20 }
  0x1f   :  { %p2487_p0 = por %p2486_p13, %p2485_p12 }
  0x21   :  { %p2488_p1 = pnand %p2487_p0, %p2481_p11 }
  0x23   :  { %2491 = shalt.err (!%p2488_p1)
}
  0x24   :  { %s2616_s1 = smov 64   ;;  %s2617_s21 = smov 4  }
  0x25   :  { %63 = dma.hbm_to_vmem [thread:$0]  %s3216_s3, 256, %s2664_s24, [#allocation9], %s2616_s1, %s2616_s1, %s2617_s21  }
  0x26   :  { %s2618_s25 = smov [#allocation2]   ;;  %s2619_s27 = smov [#allocation7]  }
  0x27   :  { %s21_s26 = sshll.u32 %s2618_s25, 4  ;;  %s45_s28 = sshll.u32 %s2619_s27, 4  ;;  %s22_s26 = int_to_ptr.vmem [resolvable:$true] %s21_s26  ;;  %s2701_s28 = int_to_ptr.vmem [resolvable:$true] %s45_s28 }
  0x28   :  { %s2492_s7 = scalar_lea.hbm %s3213_s0, 256 }
  0x29   :  { %p2493_p2 = scmp.ne.s32.totalorder %s3213_s0, %s2492_s7  ;;  %p2496_p3 = scmp.lt.u32.totalorder %s2492_s7, %s3213_s0 }
  0x2b   :  { %p2498_p4 = pnand %p2496_p3, %p2493_p2 }
  0x2d   :  { %2501 = shalt.err (!%p2498_p4)
}
  0x2e   :  { %s2502_s3 = scalar_lea.vmem %s22_s26, 256  ;;  %p2507_p6 = scmp.lt.s32.totalorder %s22_s26, %s22_s26 }
  0x2f   :  { %p2503_p5 = scmp.ne.s32.totalorder %s22_s26, %s2502_s3  ;;  %p2508_p7 = scmp.lt.s32.totalorder %s2502_s3, %s2502_s3 }
  0x31   :  { %p2509_p8 = por %p2508_p7, %p2507_p6 }
  0x33   :  { %p2510_p9 = pnand %p2509_p8, %p2503_p5 }
  0x35   :  { %2513 = shalt.err (!%p2510_p9)
}
  0x36   :  { %27 = dma.hbm_to_vmem [thread:$0]  %s3213_s0, 256, %s22_s26, [#allocation3], %s2614_s9, %s2614_s9, %s2615_s10  }
  0x37   :  { %s2514_s17 = scalar_lea.hbm %s3215_s2, 256 }
  0x38   :  { %p2515_p10 = scmp.ne.s32.totalorder %s3215_s2, %s2514_s17  ;;  %p2518_p11 = scmp.lt.u32.totalorder %s2514_s17, %s3215_s2 }
  0x3a   :  { %p2520_p12 = pnand %p2518_p11, %p2515_p10 }
  0x3c   :  { %2523 = shalt.err (!%p2520_p12)
}
  0x3d   :  { %s2524_s23 = scalar_lea.vmem %s2701_s28, 256  ;;  %p2529_p0 = scmp.lt.s32.totalorder %s2701_s28, %s2701_s28 }
  0x3e   :  { %p2525_p13 = scmp.ne.s32.totalorder %s2701_s28, %s2524_s23  ;;  %p2530_p1 = scmp.lt.s32.totalorder %s2524_s23, %s2524_s23 }
  0x40   :  { %p2531_p2 = por %p2530_p1, %p2529_p0 }
  0x42   :  { %p2532_p3 = pnand %p2531_p2, %p2525_p13 }
  0x44   :  { %2535 = shalt.err (!%p2532_p3)
}
  0x45   :  { %51 = dma.hbm_to_vmem [thread:$0]  %s3215_s2, 256, %s2701_s28, [#allocation6], %s2614_s9, %s2614_s9, %s2615_s10  }
  0x46   :  { %s2620_s26 = smov [#allocation10]   ;;  %s2621_s29 = smov [#allocation11]  }
  0x47   :  { %s69_s27 = sshll.u32 %s2620_s26, 4  ;;  %s81_s30 = sshll.u32 %s2621_s29, 4  ;;  %s70_s27 = int_to_ptr.vmem [resolvable:$true] %s69_s27  ;;  %s2738_s30 = int_to_ptr.vmem [resolvable:$true] %s81_s30 }
  0x48   :  { %s2536_s11 = scalar_lea.hbm %s3217_s4, 256 }
  0x49   :  { %p2537_p4 = scmp.ne.s32.totalorder %s3217_s4, %s2536_s11  ;;  %p2540_p5 = scmp.lt.u32.totalorder %s2536_s11, %s3217_s4 }
  0x4b   :  { %p2542_p6 = pnand %p2540_p5, %p2537_p4 }
  0x4d   :  { %2545 = shalt.err (!%p2542_p6)
}
  0x4e   :  { %s2546_s2 = scalar_lea.vmem %s70_s27, 256  ;;  %p2551_p8 = scmp.lt.s32.totalorder %s70_s27, %s70_s27 }
  0x4f   :  { %p2547_p7 = scmp.ne.s32.totalorder %s70_s27, %s2546_s2  ;;  %p2552_p9 = scmp.lt.s32.totalorder %s2546_s2, %s2546_s2 }
  0x51   :  { %p2553_p10 = por %p2552_p9, %p2551_p8 }
  0x53   :  { %p2554_p11 = pnand %p2553_p10, %p2547_p7 }
  0x55   :  { %2557 = shalt.err (!%p2554_p11)
}
  0x56   :  { %75 = dma.hbm_to_vmem [thread:$0]  %s3217_s4, 256, %s70_s27, [#allocation9], %s2616_s1, %s2616_s1, %s2617_s21  }
  0x57   :  { %s2558_s17 = scalar_lea.hbm %s3218_s5, 256 }
  0x58   :  { %p2559_p12 = scmp.ne.s32.totalorder %s3218_s5, %s2558_s17  ;;  %p2562_p13 = scmp.lt.u32.totalorder %s2558_s17, %s3218_s5 }
  0x5a   :  { %p2564_p0 = pnand %p2562_p13, %p2559_p12 }
  0x5c   :  { %2567 = shalt.err (!%p2564_p0)
}
  0x5d   :  { %s2568_s23 = scalar_lea.vmem %s2738_s30, 256  ;;  %p2573_p2 = scmp.lt.s32.totalorder %s2738_s30, %s2738_s30 }
  0x5e   :  { %p2569_p1 = scmp.ne.s32.totalorder %s2738_s30, %s2568_s23  ;;  %p2574_p3 = scmp.lt.s32.totalorder %s2568_s23, %s2568_s23 }
  0x60   :  { %p2575_p4 = por %p2574_p3, %p2573_p2 }
  0x62   :  { %p2576_p5 = pnand %p2575_p4, %p2569_p1 }
  0x64   :  { %2579 = shalt.err (!%p2576_p5)
}
  0x65   :  { %87 = dma.hbm_to_vmem [thread:$0]  %s3218_s5, 256, %s2738_s30, [#allocation12], %s2616_s1, %s2616_s1, %s2617_s21  }
  0x66   :  { %2602 = dma.done.wait [#allocation3], 256  }
  0x67   :  { %2603 = vsyncadd [#allocation3], 4294967040 }
  0x68   :  { %2604 = dma.done.wait [#allocation6], 512  }
  0x69   :  { %2605 = vsyncadd [#allocation6], 4294966784 }
  0x6a   :  { %2606 = dma.done.wait [#allocation9], 512  }
  0x6b   :  { %2607 = vsyncadd [#allocation9], 4294966784 }
  0x6c   :  { %2608 = dma.done.wait [#allocation12], 256  }
  0x6d   :  { %2609 = vsyncadd [#allocation12], 4294967040  ;;  %v2622_v0 = vmov 0.0   ;;  %vm2623_vm0 = vmmov 0   ;;  %v2410_v1 = vld [vmem:[#allocation10] sm:$0xff]   ;;  %v2411_v2 = vld [vmem:[#allocation8] sm:$0xff]  }
  0x6e   :  { %2281 = vmatprep.subr.bf16.mxu1 %v2622_v0  ;;  %2273 = vmatprep.subr.bf16.mxu0 %v2622_v0  ;;  %v2412_v3 = vld [vmem:[#allocation10 + $0x8] sm:$0xff]   ;;  %vm132_vm1 = vcmask 1041409   ;;  %vm135_vm2 = vcmask 1042434   ;;  %vm138_vm3 = vcmask 1043459   ;;  %vm141_vm4 = vcmask 1044484   ;;  %v2413_v31 = vld [vmem:[#allocation8 + $0x8] sm:$0xff]  }
  0x6f   :  { %2285 = vmatprep.mubr.msk.bf16.mxu1 %vm2623_vm0, %v2622_v0  ;;  %2277 = vmatprep.mubr.msk.bf16.mxu0 %vm2623_vm0, %v2622_v0  ;;  %vm144_vm5 = vcmask 1045509   ;;  %vm147_vm6 = vcmask 1046534   ;;  %v178_v4 = vld [vmem:[#allocation5 + $0x2] sm:$0x1]  ;;  %v179_v5 = vld [vmem:[#allocation5 + $0x4] sm:$0x1] }
  0x70   :  { %2282 = vmatpush3.bf16.msra.mxu1 %v2410_v1  ;;  %2274 = vmatpush3.bf16.msra.mxu0 %v2411_v2  ;;  %v180_v6 = vld [vmem:[#allocation5 + $0x6] sm:$0x1]  ;;  %v177_v7 = vld [vmem:[#allocation5] sm:$0x1]  ;;  %v181_v8 = vld [vmem:[#allocation5 + $0x8] sm:$0x1] }
  0x71   :  { %2283 = vmatprep.subr.bf16.mxu1 %v2622_v0  ;;  %2275 = vmatprep.subr.bf16.mxu0 %v2622_v0  ;;  %v182_v9 = vld [vmem:[#allocation5 + $0xa] sm:$0x1]  ;;  %v183_v10 = vld [vmem:[#allocation5 + $0xc] sm:$0x1]  ;;  %v184_v11 = vld [vmem:[#allocation5 + $0xe] sm:$0x1] }
  0x72   :  { %v185_v12 = vld [vmem:[#allocation5 + $0x1] sm:$0x1]  ;;  %v186_v13 = vld [vmem:[#allocation5 + $0x3] sm:$0x1]  ;;  %v187_v14 = vld [vmem:[#allocation5 + $0x5] sm:$0x1] }
  0x73   :  { %v188_v15 = vld [vmem:[#allocation5 + $0x7] sm:$0x1]  ;;  %v189_v16 = vld [vmem:[#allocation5 + $0x9] sm:$0x1]  ;;  %v190_v17 = vld [vmem:[#allocation5 + $0xb] sm:$0x1] }
  0x74   :  { %2284 = vmatpush3.bf16.msra.mxu1 %v2412_v3  ;;  %v191_v18 = vld [vmem:[#allocation5 + $0xd] sm:$0x1]  ;;  %vm150_vm7 = vcmask 1047559   ;;  %v192_v19 = vld [vmem:[#allocation5 + $0xf] sm:$0x1]  ;;  %v201_v20 = vrot.slane %v178_v4, 7  ;;  %2276 = vmatpush3.bf16.msra.mxu0 %v2413_v31 }
  0x75   :  { %2297 = vmatprep.subr.bf16.mxu1 %v2622_v0  ;;  %v203_v21 = vrot.slane %v179_v5, 6  ;;  %v205_v22 = vrot.slane %v180_v6, 5  ;;  %v207_v23 = vrot.slane %v181_v8, 4  ;;  %v209_v24 = vrot.slane %v182_v9, 3  ;;  %v108_v36 = vld [vmem:[#allocation2 + $0x2] sm:$0x1]  ;;  %2289 = vmatprep.subr.bf16.mxu0 %v2622_v0 }
  0x76   :  { %v211_v25 = vrot.slane %v183_v10, 2  ;;  %v224_v26 = vrot.slane %v186_v13, 7  ;;  %v202_v27 = vsel %vm132_vm1, %v201_v20, %v177_v7  ;;  %v226_v28 = vrot.slane %v187_v14, 6  ;;  %v107_v44 = vld [vmem:[#allocation2] sm:$0x1]  ;;  %s2624_s5 = smov 96  }
  0x77   :  { %v228_v29 = vrot.slane %v188_v15, 5  ;;  %v230_v30 = vrot.slane %v189_v16, 4  ;;  %v204_v32 = vsel %vm135_vm2, %v203_v21, %v202_v27  ;;  %v213_v33 = vrot.slane %v184_v11, 1  ;;  %v109_v45 = vld [vmem:[#allocation2 + $0x4] sm:$0x1]  ;;  %s2625_s21 = smov 112  }
  0x78   :  { %v225_v34 = vsel %vm132_vm1, %v224_v26, %v185_v12  ;;  %v232_v35 = vrot.slane %v190_v17, 3  ;;  %v206_v37 = vsel %vm138_vm3, %v205_v22, %v204_v32  ;;  %v234_v39 = vrot.slane %v191_v18, 2  ;;  %v110_v48 = vld [vmem:[#allocation2 + $0x6] sm:$0x1]  ;;  %v111_v49 = vld [vmem:[#allocation2 + $0x8] sm:$0x1] }
  0x79   :  { %v227_v38 = vsel %vm135_vm2, %v226_v28, %v225_v34  ;;  %v131_v40 = vrot.slane %v108_v36, 7  ;;  %v208_v41 = vsel %vm141_vm4, %v207_v23, %v206_v37  ;;  %v236_v43 = vrot.slane %v192_v19, 1  ;;  %v112_v50 = vld [vmem:[#allocation2 + $0xa] sm:$0x1]  ;;  %v113_v53 = vld [vmem:[#allocation2 + $0xc] sm:$0x1] }
  0x7a   :  { %v229_v42 = vsel %vm138_vm3, %v228_v29, %v227_v38  ;;  %vm327_vm8 = vcmask 261120   ;;  %v210_v46 = vsel %vm144_vm5, %v209_v24, %v208_v41  ;;  %v116_v54 = vld [vmem:[#allocation2 + $0x3] sm:$0x1]  ;;  %v117_v55 = vld [vmem:[#allocation2 + $0x5] sm:$0x1]  ;;  %v134_v2 = vrot.slane %v109_v45, 6 }
  0x7b   :  { %v231_v47 = vsel %vm141_vm4, %v230_v30, %v229_v42  ;;  %v212_v51 = vsel %vm147_vm6, %v211_v25, %v210_v46  ;;  %v114_v58 = vld [vmem:[#allocation2 + $0xe] sm:$0x1]  ;;  %v115_v59 = vld [vmem:[#allocation2 + $0x1] sm:$0x1]  ;;  %v118_v60 = vld [vmem:[#allocation2 + $0x7] sm:$0x1]  ;;  %v133_v63 = vsel %vm132_vm1, %v131_v40, %v107_v44 }
  0x7c   :  { %v233_v52 = vsel %vm144_vm5, %v232_v35, %v231_v47  ;;  %v214_v56 = vsel %vm150_vm7, %v213_v33, %v212_v51  ;;  %v119_v61 = vld [vmem:[#allocation2 + $0x9] sm:$0x1]  ;;  %v120_v62 = vld [vmem:[#allocation2 + $0xb] sm:$0x1]  ;;  %v137_v3 = vrot.slane %v110_v48, 5  ;;  %v140_v4 = vrot.slane %v111_v49, 4 }
  0x7d   :  { %v235_v57 = vsel %vm147_vm6, %v234_v39, %v233_v52  ;;  %v121_v6 = vld [vmem:[#allocation2 + $0xd] sm:$0x1]  ;;  %v143_v7 = vrot.slane %v112_v50, 3  ;;  %v146_v8 = vrot.slane %v113_v53, 2  ;;  %v136_v9 = vsel %vm135_vm2, %v134_v2, %v133_v63  ;;  %v122_v13 = vld [vmem:[#allocation2 + $0xf] sm:$0x1] }
  0x7e   :  { %v237_v1 = vsel %vm150_vm7, %v236_v43, %v235_v57  ;;  %v161_v10 = vrot.slane %v116_v54, 7  ;;  %v163_v11 = vrot.slane %v117_v55, 6  ;;  %v165_v12 = vrot.slane %v118_v60, 5  ;;  %s2626_s25 = smov 80   ;;  %v2414_v45 = vld [vmem:[#allocation11] sm:$0xff]   ;;  %v2415_v46 = vld [vmem:[#allocation11 + $0x8] sm:$0xff]  }
  0x7f   :  { %v239_v5 = vpack.c.bf16 %v237_v1, %v214_v56  ;;  %v139_v14 = vsel %vm138_vm3, %v137_v3, %v136_v9  ;;  %v167_v15 = vrot.slane %v119_v61, 4  ;;  %v149_v17 = vrot.slane %v114_v58, 1  ;;  %v241_v47 = vld [vmem:[#allocation7 + $0x2] sm:$0x1]  ;;  %v242_v48 = vld [vmem:[#allocation7 + $0x4] sm:$0x1] }
  0x80   :  { %v142_v16 = vsel %vm141_vm4, %v140_v4, %v139_v14  ;;  %v162_v18 = vsel %vm132_vm1, %v161_v10, %v115_v59  ;;  %v169_v19 = vrot.slane %v120_v62, 3  ;;  %v171_v22 = vrot.slane %v121_v6, 2  ;;  %v240_v49 = vld [vmem:[#allocation7] sm:$0x1]  ;;  %v243_v50 = vld [vmem:[#allocation7 + $0x6] sm:$0x1] }
  0x81   :  { %2286 = vmatmul.mubr.msk.bf16.vlgmr.msra.gmra.mrb[0].mxu1 %vm327_vm8, %v239_v5  ;;  %v145_v20 = vsel %vm144_vm5, %v143_v7, %v142_v16  ;;  %v164_v21 = vsel %vm135_vm2, %v163_v11, %v162_v18  ;;  %v173_v25 = vrot.slane %v122_v13, 1  ;;  %vm487_vm9 = vcmask 130048   ;;  %v244_v51 = vld [vmem:[#allocation7 + $0x8] sm:$0x1]  ;;  %v245_v52 = vld [vmem:[#allocation7 + $0xa] sm:$0x1] }
  0x82   :  { %2299 = vmatprep.mubr.msk.bf16.mxu1 %vm2623_vm0, %v2622_v0  ;;  %v148_v23 = vsel %vm147_vm6, %v146_v8, %v145_v20  ;;  %v166_v24 = vsel %vm138_vm3, %v165_v12, %v164_v21  ;;  %v246_v53 = vld [vmem:[#allocation7 + $0xc] sm:$0x1]  ;;  %v248_v54 = vld [vmem:[#allocation7 + $0x1] sm:$0x1]  ;;  %v249_v55 = vld [vmem:[#allocation7 + $0x3] sm:$0x1] }
  0x83   :  { %v168_v26 = vsel %vm141_vm4, %v167_v15, %v166_v24  ;;  %v151_v27 = vsel %vm150_vm7, %v149_v17, %v148_v23  ;;  %v247_v56 = vld [vmem:[#allocation7 + $0xe] sm:$0x1]  ;;  %v250_v57 = vld [vmem:[#allocation7 + $0x5] sm:$0x1]  ;;  %v251_v58 = vld [vmem:[#allocation7 + $0x7] sm:$0x1] }
  0x84   :  { %v170_v28 = vsel %vm144_vm5, %v169_v19, %v168_v26  ;;  %v252_v59 = vld [vmem:[#allocation7 + $0x9] sm:$0x1]  ;;  %v253_v60 = vld [vmem:[#allocation7 + $0xb] sm:$0x1]  ;;  %v264_v61 = vrot.slane %v241_v47, 7  ;;  %v266_v62 = vrot.slane %v242_v48, 6 }
  0x85   :  { %v172_v29 = vsel %vm147_vm6, %v171_v22, %v170_v28  ;;  %v268_v63 = vrot.slane %v243_v50, 5  ;;  %v254_v1 = vld [vmem:[#allocation7 + $0xd] sm:$0x1]  ;;  %v270_v2 = vrot.slane %v244_v51, 4  ;;  %v272_v3 = vrot.slane %v245_v52, 3 }
  0x86   :  { %v174_v30 = vsel %vm150_vm7, %v173_v25, %v172_v29  ;;  %v287_v4 = vrot.slane %v249_v55, 7  ;;  %v255_v5 = vld [vmem:[#allocation7 + $0xf] sm:$0x1]  ;;  %v265_v6 = vsel %vm132_vm1, %v264_v61, %v240_v49  ;;  %v289_v7 = vrot.slane %v250_v57, 6 }
  0x87   :  { %v176_v31 = vpack.c.bf16 %v174_v30, %v151_v27  ;;  %v291_v8 = vrot.slane %v251_v58, 5  ;;  %v293_v9 = vrot.slane %v252_v59, 4  ;;  %v267_v10 = vsel %vm135_vm2, %v266_v62, %v265_v6 }
  0x88   :  { %v274_v11 = vrot.slane %v246_v53, 2  ;;  %v288_v12 = vsel %vm132_vm1, %v287_v4, %v248_v54  ;;  %v295_v13 = vrot.slane %v253_v60, 3  ;;  %v269_v14 = vsel %vm138_vm3, %v268_v63, %v267_v10 }
  0x89   :  { %2278 = vmatmul.mubr.msk.bf16.vlgmr.msra.gmra.mrb[0].mxu0 %vm327_vm8, %v176_v31  ;;  %v276_v15 = vrot.slane %v247_v56, 1  ;;  %v290_v16 = vsel %vm135_vm2, %v289_v7, %v288_v12  ;;  %v297_v17 = vrot.slane %v254_v1, 2  ;;  %v271_v18 = vsel %vm141_vm4, %v270_v2, %v269_v14 }
  0x8a   :  { %2293 = vmatprep.mubr.msk.bf16.mxu0 %vm2623_vm0, %v2622_v0  ;;  %2290 = vmatpush3.bf16.msra.mxu0 %v2414_v45  ;;  %v292_v19 = vsel %vm138_vm3, %v291_v8, %v290_v16  ;;  %v299_v20 = vrot.slane %v255_v5, 1  ;;  %v273_v21 = vsel %vm144_vm5, %v272_v3, %v271_v18  ;;  %vm534_vm10 = vcmask 64512  }
  0x8b   :  { %2291 = vmatprep.subr.bf16.mxu0 %v2622_v0  ;;  %v294_v22 = vsel %vm141_vm4, %v293_v9, %v292_v19  ;;  %v275_v23 = vsel %vm147_vm6, %v274_v11, %v273_v21  ;;  %vm550_vm11 = vcmask 1043456   ;;  %vm652_vm12 = vcmask 253952  }
  0x8c   :  { %v296_v24 = vsel %vm144_vm5, %v295_v13, %v294_v22  ;;  %v277_v25 = vsel %vm150_vm7, %v276_v15, %v275_v23  ;;  %vm880_vm13 = vcmask 516352   ;;  %vm1105_vm14 = vcmask 778752  }
  0x8d   :  { %v298_v26 = vsel %vm147_vm6, %v297_v17, %v296_v24  ;;  %vm1330_vm15 = vcmask 1041152  }
  0x8e   :  { %2292 = vmatpush3.bf16.msra.mxu0 %v2415_v46  ;;  %v300_v27 = vsel %vm150_vm7, %v299_v20, %v298_v26 }
  0x8f   :  { %2303 = vmatprep.subr.bf16.mxu0 %v2622_v0  ;;  %v302_v28 = vpack.c.bf16 %v300_v27, %v277_v25 }
  0x91   :  { %2294 = vmatmul.mubr.msk.bf16.vlgmr.msra.gmra.mrb[4].mxu0 %vm327_vm8, %v302_v28 }
  0x92   :  { %2305 = vmatprep.mubr.msk.bf16.mxu0 %vm2623_vm0, %v2622_v0 }
 0x154   :  { %v421_v32 = vpop.f32.mrb[0].mxu1 }
 0x155   :  { %v485_v33 = vpack.c.bf16 %v421_v32, %v421_v32  ;;  %v2287_v34 = vpop.f32.mrb[1].mxu1 }
 0x156   :  { %v424_v35 = vpop.f32.mrb[2].mxu1 }
 0x157   :  { %891 = vrot.lane.b32.xlu1 %v485_v33, %s2624_s5  ;;  %665 = vrot.lane.b32.xlu0 %v485_v33, %s2625_s21  ;;  %v2288_v36 = vpop.f32.mrb[3].mxu1  ;;  %v492_v37 = vsel %vm487_vm9, %v485_v33, 0  ;;  %v2826_v43 = vpack.c.bf16 %v424_v35, %v424_v35 }
 0x158   :  { %2298 = vmatpush3.bf16.xpose.msra.mxu1 %v492_v37 }
 0x159   :  { %2309 = vmatprep.subr.bf16.mxu1 %v2622_v0 }
 0x15c   :  { %v365_v38 = vpop.f32.mrb[0].mxu0 }
 0x15d   :  { %v484_v39 = vpack.c.bf16 %v365_v38, %v365_v38  ;;  %v2279_v40 = vpop.f32.mrb[1].mxu0  ;;  %v1346_v38 = vsel %vm487_vm9, %v2826_v43, 0 }
 0x15e   :  { %v368_v41 = vpop.f32.mrb[2].mxu0 }
 0x15f   :  { %889 = vrot.lane.b32.xlu1 %v484_v39, %s2624_s5  ;;  %662 = vrot.lane.b32.xlu0 %v484_v39, %s2625_s21  ;;  %v2280_v42 = vpop.f32.mrb[3].mxu0  ;;  %v2828_v44 = vpack.c.bf16 %v368_v41, %v368_v41 }
 0x160   :  { %2300 = vmatmul.mubr.msk.bf16.vlgmr.msra.gmra.mrb[4].mxu1 %vm487_vm9, %v484_v39 }
 0x161   :  { %2311 = vmatprep.mubr.msk.bf16.mxu1 %vm2623_vm0, %v2622_v0 }
 0x163   :  { %1114 = vrot.lane.b32.xlu1 %v484_v39, %s2626_s25  ;;  %1116 = vrot.lane.b32.xlu0 %v485_v33, %s2626_s25 }
 0x167   :  { %1516 = vrot.lane.b32.xlu0 %v2826_v43, %s2625_s21  ;;  %1513 = vrot.lane.b32.xlu1 %v2828_v44, %s2625_s21 }
 0x16b   :  { %1741 = vrot.lane.b32.xlu0 %v2826_v43, %s2624_s5  ;;  %1739 = vrot.lane.b32.xlu1 %v2828_v44, %s2624_s5 }
 0x16f   :  { %1965 = vrot.lane.b32.xlu0 %v2826_v43, %s2626_s25  ;;  %1963 = vrot.lane.b32.xlu1 %v2828_v44, %s2626_s25 }
 0x1c9   :  { %v666_v29 = vpop.permute.xlu0 %665  ;;  %v892_v31 = vpop.permute.xlu1 %891 }
 0x1ca   :  { %v671_v30 = vsel %vm487_vm9, %v666_v29, 0  ;;  %v897_v33 = vsel %vm487_vm9, %v892_v31, 0 }
 0x1cb   :  { %2310 = vmatpush3.bf16.xpose.msra.mxu1 %v671_v30  ;;  %v477_v30 = vpop.f32.mrb[4].mxu0 }
 0x1cc   :  { %2321 = vmatprep.subr.bf16.mxu1 %v2622_v0  ;;  %v2295_v31 = vpop.f32.mrb[5].mxu0 }
 0x1d1   :  { %v663_v32 = vpop.permute.xlu0 %662  ;;  %v890_v35 = vpop.permute.xlu1 %889 }
 0x1d2   :  { %2312 = vmatmul.mubr.msk.bf16.vlgmr.msra.gmra.mrb[8].mxu1 %vm487_vm9, %v663_v32  ;;  %v2909_v32 = vpop.f32.mrb[6].mxu0 }
 0x1d3   :  { %2322 = vmatpush3.bf16.xpose.msra.mxu1 %v897_v33  ;;  %2323 = vmatprep.mubr.msk.bf16.mxu1 %vm2623_vm0, %v2622_v0  ;;  %v2296_v33 = vpop.f32.mrb[7].mxu0 }
 0x1d4   :  { %2333 = vmatprep.subr.bf16.mxu1 %v2622_v0 }
 0x1d5   :  { %v1117_v34 = vpop.permute.xlu0 %1116  ;;  %v1115_v37 = vpop.permute.xlu1 %1114 }
 0x1d6   :  { %v1122_v36 = vsel %vm487_vm9, %v1117_v34, 0  ;;  %v486_v34 = vpack.c.bf16 %v477_v30, %v477_v30 }
 0x1d9   :  { %v1517_v39 = vpop.permute.xlu0 %1516  ;;  %v1514_v42 = vpop.permute.xlu1 %1513 }
 0x1da   :  { %2324 = vmatmul.mubr.msk.bf16.vlgmr.msra.gmra.mrb[12].mxu1 %vm487_vm9, %v890_v35  ;;  %v1522_v40 = vsel %vm487_vm9, %v1517_v39, 0  ;;  %v552_v35 = vsel %vm550_vm11, %v486_v34, 0 }
 0x1db   :  { %2334 = vmatpush3.bf16.xpose.msra.mxu1 %v1122_v36  ;;  %2335 = vmatprep.mubr.msk.bf16.mxu1 %vm2623_vm0, %v2622_v0 }
 0x1dc   :  { %2345 = vmatprep.subr.bf16.mxu1 %v2622_v0  ;;  %2304 = vmatpush3.bf16.msra.mxu0 %v552_v35 }
 0x1dd   :  { %v1742_v41 = vpop.permute.xlu0 %1741  ;;  %2315 = vmatprep.subr.bf16.mxu0 %v2622_v0 }
 0x1de   :  { %v1747_v43 = vsel %vm487_vm9, %v1742_v41, 0 }
 0x1e1   :  { %v1966_v45 = vpop.permute.xlu0 %1965 }
 0x1e2   :  { %2336 = vmatmul.mubr.msk.bf16.vlgmr.msra.gmra.mrb[16].mxu1 %vm487_vm9, %v1115_v37  ;;  %v1971_v46 = vsel %vm487_vm9, %v1966_v45, 0 }
 0x1e3   :  { %2346 = vmatpush3.bf16.xpose.msra.mxu1 %v1346_v38  ;;  %2347 = vmatprep.mubr.msk.bf16.mxu1 %vm2623_vm0, %v2622_v0 }
 0x1e4   :  { %2357 = vmatprep.subr.bf16.mxu1 %v2622_v0 }
 0x1ea   :  { %2348 = vmatmul.mubr.msk.bf16.vlgmr.msra.gmra.mrb[20].mxu1 %vm487_vm9, %v2828_v44  ;;  %v1740_v44 = vpop.permute.xlu1 %1739 }
 0x1eb   :  { %2358 = vmatpush3.bf16.xpose.msra.mxu1 %v1522_v40  ;;  %2359 = vmatprep.mubr.msk.bf16.mxu1 %vm2623_vm0, %v2622_v0 }
 0x1ec   :  { %2369 = vmatprep.subr.bf16.mxu1 %v2622_v0 }
 0x1ee   :  { %v1964_v47 = vpop.permute.xlu1 %1963 }
 0x1f2   :  { %2360 = vmatmul.mubr.msk.bf16.vlgmr.msra.gmra.mrb[24].mxu1 %vm487_vm9, %v1514_v42 }
 0x1f3   :  { %2370 = vmatpush3.bf16.xpose.msra.mxu1 %v1747_v43  ;;  %2371 = vmatprep.mubr.msk.bf16.mxu1 %vm2623_vm0, %v2622_v0 }
 0x1f4   :  { %2381 = vmatprep.subr.bf16.mxu1 %v2622_v0 }
 0x1fa   :  { %2372 = vmatmul.mubr.msk.bf16.vlgmr.msra.gmra.mrb[28].mxu1 %vm487_vm9, %v1740_v44 }
 0x1fb   :  { %2382 = vmatpush3.bf16.xpose.msra.mxu1 %v1971_v46  ;;  %2383 = vmatprep.mubr.msk.bf16.mxu1 %vm2623_vm0, %v2622_v0 }
 0x202   :  { %2384 = vmatmul.mubr.msk.bf16.vlgmr.msra.gmra.mrb[32].mxu1 %vm487_vm9, %v1964_v47 }
 0x233   :  { %v528_v48 = vpop.f32.mrb[4].mxu1 }
 0x234   :  { %v2301_v49 = vpop.f32.mrb[5].mxu1  ;;  %v535_v50 = vsel %vm534_vm10, %v528_v48, -inf }
 0x235   :  { %536 = vmax.xlane.f32.xlu0 %v535_v50  ;;  %v531_v51 = vpop.f32.mrb[6].mxu1 }
 0x236   :  { %v2302_v52 = vpop.f32.mrb[7].mxu1 }
 0x2a5   :  { %v707_v53 = vpop.f32.mrb[8].mxu1 }
 0x2a6   :  { %v2313_v54 = vpop.f32.mrb[9].mxu1  ;;  %v713_v55 = vsel %vm534_vm10, %v707_v53, -inf }
 0x2a7   :  { %v710_v56 = vpop.f32.mrb[10].mxu1  ;;  %714 = vmax.xlane.f32.xlu1 %v713_v55 }
 0x2a8   :  { %v2314_v57 = vpop.f32.mrb[11].mxu1 }
 0x2ad   :  { %v933_v58 = vpop.f32.mrb[12].mxu1 }
 0x2ae   :  { %v2325_v59 = vpop.f32.mrb[13].mxu1  ;;  %v939_v60 = vsel %vm534_vm10, %v933_v58, -inf }
 0x2af   :  { %940 = vmax.xlane.f32.xlu0 %v939_v60  ;;  %v936_v61 = vpop.f32.mrb[14].mxu1 }
 0x2b0   :  { %v2326_v62 = vpop.f32.mrb[15].mxu1 }
 0x2b5   :  { %v1158_v63 = vpop.f32.mrb[16].mxu1 }
 0x2b6   :  { %v2337_v1 = vpop.f32.mrb[17].mxu1  ;;  %v1164_v2 = vsel %vm534_vm10, %v1158_v63, -inf }
 0x2b7   :  { %1165 = vmax.xlane.f32.xlu0 %v1164_v2  ;;  %v1161_v3 = vpop.f32.mrb[18].mxu1 }
 0x2b8   :  { %v2338_v4 = vpop.f32.mrb[19].mxu1 }
 0x2bd   :  { %v2895_v5 = vpop.f32.mrb[20].mxu1 }
 0x2be   :  { %v2349_v6 = vpop.f32.mrb[21].mxu1  ;;  %v1388_v7 = vsel %vm534_vm10, %v2895_v5, -inf }
 0x2bf   :  { %1389 = vmax.xlane.f32.xlu1 %v1388_v7  ;;  %v1385_v8 = vpop.f32.mrb[22].mxu1 }
 0x2c0   :  { %v2350_v9 = vpop.f32.mrb[23].mxu1 }
 0x2c2   :  { %v537_v10 = vpop.xlane.xlu0 %536 }
 0x2c3   :  { %v538_v11 = vsub.f32 %v528_v48, %v537_v10 }
 0x2c5   :  { %v539_v12 = vmul.f32 1.442695, %v538_v11  ;;  %v2899_v13 = vpop.f32.mrb[24].mxu1 }
 0x2c6   :  { %v2361_v14 = vpop.f32.mrb[25].mxu1  ;;  %v1564_v15 = vsel %vm534_vm10, %v2899_v13, -inf }
 0x2c7   :  { %2416 = vpow2.f32 %v539_v12  ;;  %1565 = vmax.xlane.f32.xlu0 %v1564_v15  ;;  %v1561_v16 = vpop.f32.mrb[26].mxu1  ;;  %v1341_v12 = vpack.c.bf16 %v2909_v32, %v2909_v32 }
 0x2c8   :  { %v2362_v17 = vpop.f32.mrb[27].mxu1 }
 0x2c9   :  { %v1404_v31 = vsel %vm550_vm11, %v1341_v12, 0 }
 0x2cd   :  { %v2903_v18 = vpop.f32.mrb[28].mxu1 }
 0x2ce   :  { %v2373_v19 = vpop.f32.mrb[29].mxu1  ;;  %v1789_v20 = vsel %vm534_vm10, %v2903_v18, -inf }
 0x2cf   :  { %1790 = vmax.xlane.f32.xlu1 %v1789_v20  ;;  %v1786_v21 = vpop.f32.mrb[30].mxu1 }
 0x2d0   :  { %v2374_v22 = vpop.f32.mrb[31].mxu1 }
 0x2d1   :  { %v2417_v23 = vpop.eup %2416 }
 0x2d2   :  { %v541_v24 = vsel %vm534_vm10, %v2417_v23, 0.0 }
 0x2d3   :  { %542 = vadd.xlane.f32.xlu1 %v541_v24 }
 0x2d5   :  { %v2007_v25 = vpop.f32.mrb[32].mxu1 }
 0x2d6   :  { %v2385_v26 = vpop.f32.mrb[33].mxu1  ;;  %v2013_v27 = vsel %vm534_vm10, %v2007_v25, -inf }
 0x2d7   :  { %2014 = vmax.xlane.f32.xlu0 %v2013_v27  ;;  %v2010_v28 = vpop.f32.mrb[34].mxu1 }
 0x2d8   :  { %v2386_v29 = vpop.f32.mrb[35].mxu1 }
 0x334   :  { %v715_v36 = vpop.xlane.xlu1 %714 }
 0x335   :  { %v716_v37 = vsub.f32 %v707_v53, %v715_v36 }
 0x337   :  { %v717_v38 = vmul.f32 1.442695, %v716_v37 }
 0x339   :  { %2418 = vpow2.f32 %v717_v38 }
 0x33c   :  { %v941_v39 = vpop.xlane.xlu0 %940 }
 0x33d   :  { %v942_v40 = vsub.f32 %v933_v58, %v941_v39 }
 0x33f   :  { %v943_v41 = vmul.f32 1.442695, %v942_v40 }
 0x341   :  { %2420 = vpow2.f32 %v943_v41 }
 0x343   :  { %v2419_v42 = vpop.eup %2418 }
 0x344   :  { %v1166_v43 = vpop.xlane.xlu0 %1165  ;;  %v719_v45 = vsel %vm534_vm10, %v2419_v42, 0.0 }
 0x345   :  { %v1167_v44 = vsub.f32 %v1158_v63, %v1166_v43  ;;  %720 = vadd.xlane.f32.xlu0 %v719_v45 }
 0x347   :  { %v1168_v46 = vmul.f32 1.442695, %v1167_v44 }
 0x349   :  { %2422 = vpow2.f32 %v1168_v46 }
 0x34b   :  { %v2914_v47 = vpop.eup %2420 }
 0x34c   :  { %v945_v48 = vsel %vm534_vm10, %v2914_v47, 0.0  ;;  %v1390_v51 = vpop.xlane.xlu1 %1389 }
 0x34d   :  { %946 = vadd.xlane.f32.xlu1 %v945_v48  ;;  %v1391_v57 = vsub.f32 %v2895_v5, %v1390_v51 }
 0x34f   :  { %v1392_v60 = vmul.f32 1.442695, %v1391_v57 }
 0x353   :  { %v2918_v49 = vpop.eup %2422 }
 0x354   :  { %v1170_v50 = vsel %vm534_vm10, %v2918_v49, 0.0  ;;  %v1566_v58 = vpop.xlane.xlu0 %1565 }
 0x355   :  { %1171 = vadd.xlane.f32.xlu0 %v1170_v50  ;;  %v1567_v59 = vsub.f32 %v2899_v13, %v1566_v58 }
 0x357   :  { %v1568_v63 = vmul.f32 1.442695, %v1567_v59 }
 0x35c   :  { %v1791_v52 = vpop.xlane.xlu1 %1790 }
 0x35d   :  { %v1792_v61 = vsub.f32 %v2903_v18, %v1791_v52 }
 0x35e   :  { %951 = vrot.lane.b32.xlu1 %v486_v34, %s2616_s1 }
 0x35f   :  { %v1793_v1 = vmul.f32 1.442695, %v1792_v61 }
 0x360   :  { %v543_v53 = vpop.xlane.xlu1 %542 }
 0x361   :  { %2424 = vrcp.f32 %v543_v53 }
 0x362   :  { %1176 = vrot.lane.b32.xlu1 %v486_v34, %s2614_s9  ;;  %2426 = vpow2.f32 %v1392_v60 }
 0x363   :  { %2428 = vpow2.f32 %v1568_v63 }
 0x364   :  { %v2015_v62 = vpop.xlane.xlu0 %2014  ;;  %2430 = vpow2.f32 %v1793_v1 }
 0x365   :  { %v2016_v2 = vsub.f32 %v2007_v25, %v2015_v62 }
 0x367   :  { %v2017_v3 = vmul.f32 1.442695, %v2016_v2 }
 0x369   :  { %2432 = vpow2.f32 %v2017_v3 }
 0x36b   :  { %726 = vrot.lane.b32.xlu0 %v486_v34, %s2624_s5  ;;  %v2425_v54 = vpop.eup %2424 }
 0x36c   :  { %v545_v55 = vmul.f32 %v2425_v54, %v2417_v23  ;;  %v2427_v4 = vpop.eup %2426  ;;  %v2627_v54 = vmov 1966171168  }
 0x36d   :  { %v2931_v5 = vpop.eup %2428  ;;  %v1394_v6 = vsel %vm534_vm10, %v2427_v4, 0.0 }
 0x36e   :  { %v546_v56 = vpack.c.bf16 %v545_v55, %v545_v55  ;;  %v2934_v7 = vpop.eup %2430  ;;  %v1570_v8 = vsel %vm534_vm10, %v2931_v5, 0.0  ;;  %v597_v55 = vunpack.c.l.s4 %v2627_v54 }
 0x36f   :  { %v1795_v9 = vsel %vm534_vm10, %v2934_v7, 0.0 }
 0x370   :  { %2306 = vmatmul.mubr.msk.bf16.vlgmr.msra.gmra.mrb[8].mxu0 %vm534_vm10, %v546_v56  ;;  %v599_v56 = vlaneseq  ;;  %v598_v57 = vunpack.c.0.s8 %v597_v55 }
 0x371   :  { %2317 = vmatprep.mubr.msk.bf16.mxu0 %vm2623_vm0, %v2622_v0 }
 0x372   :  { %v600_v58 = vshrl.u32 %v599_v56, 7 }
 0x373   :  { %v2940_v10 = vpop.eup %2432 }
 0x374   :  { %v2019_v11 = vsel %vm534_vm10, %v2940_v10, 0.0  ;;  %v2986_v59 = vsub.s32 %v598_v57, %v600_v58 }
 0x386   :  { %1395 = vadd.xlane.f32.xlu1 %v1394_v6 }
 0x38a   :  { %1571 = vadd.xlane.f32.xlu1 %v1570_v8  ;;  %1796 = vadd.xlane.f32.xlu0 %v1795_v9 }
 0x38e   :  { %2020 = vadd.xlane.f32.xlu1 %v2019_v11 }
 0x39f   :  { %1801 = vrot.lane.b32.xlu1 %v1341_v12, %s2616_s1 }
 0x3a0   :  { %1577 = vrot.lane.b32.xlu0 %v1341_v12, %s2624_s5 }
 0x3a4   :  { %2025 = vrot.lane.b32.xlu0 %v1341_v12, %s2614_s9 }
 0x3d2   :  { %v721_v13 = vpop.xlane.xlu0 %720 }
 0x3d3   :  { %2434 = vrcp.f32 %v721_v13 }
 0x3da   :  { %v947_v14 = vpop.xlane.xlu1 %946 }
 0x3db   :  { %2436 = vrcp.f32 %v947_v14 }
 0x3dd   :  { %v2435_v15 = vpop.eup %2434 }
 0x3de   :  { %v723_v17 = vmul.f32 %v2435_v15, %v2419_v42  ;;  %v952_v20 = vpop.permute.xlu1 %951 }
 0x3df   :  { %v957_v23 = vsel %vm550_vm11, %v952_v20, 0 }
 0x3e0   :  { %v724_v21 = vpack.c.bf16 %v723_v17, %v723_v17  ;;  %v3003_v17 = vsub.s32 0, %v600_v58 }
 0x3e2   :  { %v1172_v16 = vpop.xlane.xlu0 %1171  ;;  %v1177_v25 = vpop.permute.xlu1 %1176 }
 0x3e3   :  { %2438 = vrcp.f32 %v1172_v16  ;;  %v1182_v28 = vsel %vm550_vm11, %v1177_v25, 0 }
 0x3e5   :  { %v2437_v22 = vpop.eup %2436 }
 0x3e6   :  { %v727_v18 = vpop.permute.xlu0 %726  ;;  %v949_v24 = vmul.f32 %v2437_v22, %v2914_v47 }
 0x3e7   :  { %v732_v19 = vsel %vm550_vm11, %v727_v18, 0 }
 0x3e8   :  { %2316 = vmatpush3.bf16.msra.mxu0 %v732_v19  ;;  %v950_v26 = vpack.c.bf16 %v949_v24, %v949_v24 }
 0x3e9   :  { %2327 = vmatprep.subr.bf16.mxu0 %v2622_v0 }
 0x3eb   :  { %2318 = vmatmul.mubr.msk.bf16.vlgmr.msra.gmra.mrb[12].mxu0 %vm534_vm10, %v724_v21 }
 0x3ec   :  { %2328 = vmatpush3.bf16.msra.mxu0 %v957_v23  ;;  %2329 = vmatprep.mubr.msk.bf16.mxu0 %vm2623_vm0, %v2622_v0 }
 0x3ed   :  { %2339 = vmatprep.subr.bf16.mxu0 %v2622_v0  ;;  %v2439_v27 = vpop.eup %2438 }
 0x3ee   :  { %v1174_v29 = vmul.f32 %v2439_v27, %v2918_v49 }
 0x3f0   :  { %v1175_v30 = vpack.c.bf16 %v1174_v29, %v1174_v29 }
 0x3f3   :  { %2330 = vmatmul.mubr.msk.bf16.vlgmr.msra.gmra.mrb[16].mxu0 %vm534_vm10, %v950_v26 }
 0x3f4   :  { %2340 = vmatpush3.bf16.msra.mxu0 %v1182_v28  ;;  %2341 = vmatprep.mubr.msk.bf16.mxu0 %vm2623_vm0, %v2622_v0 }
 0x3f5   :  { %2351 = vmatprep.subr.bf16.mxu0 %v2622_v0 }
 0x3fb   :  { %2342 = vmatmul.mubr.msk.bf16.vlgmr.msra.gmra.mrb[20].mxu0 %vm534_vm10, %v1175_v30 }
 0x3fc   :  { %2352 = vmatpush3.bf16.msra.mxu0 %v1404_v31  ;;  %2353 = vmatprep.mubr.msk.bf16.mxu0 %vm2623_vm0, %v2622_v0 }
 0x3fd   :  { %2363 = vmatprep.subr.bf16.mxu0 %v2622_v0 }
 0x413   :  { %v1396_v32 = vpop.xlane.xlu1 %1395 }
 0x414   :  { %2440 = vrcp.f32 %v1396_v32 }
 0x417   :  { %v1572_v33 = vpop.xlane.xlu1 %1571  ;;  %v1797_v34 = vpop.xlane.xlu0 %1796 }
 0x418   :  { %2442 = vrcp.f32 %v1572_v33 }
 0x419   :  { %2444 = vrcp.f32 %v1797_v34 }
 0x41b   :  { %v1578_v37 = vpop.permute.xlu0 %1577  ;;  %v2021_v40 = vpop.xlane.xlu1 %2020 }
 0x41c   :  { %v1583_v41 = vsel %vm550_vm11, %v1578_v37, 0  ;;  %2446 = vrcp.f32 %v2021_v40 }
 0x41e   :  { %v2441_v35 = vpop.eup %2440 }
 0x41f   :  { %v1398_v36 = vmul.f32 %v2441_v35, %v2427_v4  ;;  %v1802_v43 = vpop.permute.xlu1 %1801  ;;  %v2026_v48 = vpop.permute.xlu0 %2025 }
 0x420   :  { %v1807_v46 = vsel %vm550_vm11, %v1802_v43, 0  ;;  %v2031_v51 = vsel %vm550_vm11, %v2026_v48, 0 }
 0x421   :  { %v1399_v38 = vpack.c.bf16 %v1398_v36, %v1398_v36 }
 0x422   :  { %v2443_v39 = vpop.eup %2442 }
 0x423   :  { %2354 = vmatmul.mubr.msk.bf16.vlgmr.msra.gmra.mrb[24].mxu0 %vm534_vm10, %v1399_v38  ;;  %v1574_v42 = vmul.f32 %v2443_v39, %v2931_v5  ;;  %v2445_v44 = vpop.eup %2444 }
 0x424   :  { %2364 = vmatpush3.bf16.msra.mxu0 %v1583_v41  ;;  %2365 = vmatprep.mubr.msk.bf16.mxu0 %vm2623_vm0, %v2622_v0  ;;  %v1799_v47 = vmul.f32 %v2445_v44, %v2934_v7 }
 0x425   :  { %2375 = vmatprep.subr.bf16.mxu0 %v2622_v0  ;;  %v1575_v45 = vpack.c.bf16 %v1574_v42, %v1574_v42 }
 0x426   :  { %v1800_v49 = vpack.c.bf16 %v1799_v47, %v1799_v47  ;;  %v2447_v50 = vpop.eup %2446 }
 0x427   :  { %v2023_v52 = vmul.f32 %v2447_v50, %v2940_v10 }
 0x429   :  { %v2024_v53 = vpack.c.bf16 %v2023_v52, %v2023_v52 }
 0x42b   :  { %2366 = vmatmul.mubr.msk.bf16.vlgmr.msra.gmra.mrb[28].mxu0 %vm534_vm10, %v1575_v45 }
 0x42c   :  { %2376 = vmatpush3.bf16.msra.mxu0 %v1807_v46  ;;  %2377 = vmatprep.mubr.msk.bf16.mxu0 %vm2623_vm0, %v2622_v0 }
 0x42d   :  { %2387 = vmatprep.subr.bf16.mxu0 %v2622_v0 }
 0x433   :  { %2378 = vmatmul.mubr.msk.bf16.vlgmr.msra.gmra.mrb[32].mxu0 %vm534_vm10, %v1800_v49 }
 0x434   :  { %2388 = vmatpush3.bf16.msra.mxu0 %v2031_v51  ;;  %2389 = vmatprep.mubr.msk.bf16.mxu0 %vm2623_vm0, %v2622_v0 }
 0x43b   :  { %2390 = vmatmul.mubr.msk.bf16.vlgmr.msra.gmra.mrb[36].mxu0 %vm534_vm10, %v2024_v53 }
 0x443   :  { %v588_v60 = vpop.f32.mrb[8].mxu0 }
 0x444   :  { %v595_v61 = vcombine.high %v588_v60, %v588_v60  ;;  %v602_v62 = vrot.slane %v588_v60, %v2986_v59  ;;  %v2307_v63 = vpop.f32.mrb[9].mxu0 }
 0x445   :  { %v591_v1 = vpop.f32.mrb[10].mxu0 }
 0x446   :  { %v609_v0 = vrot.slane %v595_v61, %v2986_v59  ;;  %v610_v2 = vcombine.high %v602_v62, %v602_v62  ;;  %v618_v3 = vrot.slane %v602_v62, %v2986_v59  ;;  %v2308_v4 = vpop.f32.mrb[11].mxu0 }
 0x448   :  { %v611_v5 = vcombine.high %v609_v0, %v609_v0  ;;  %v625_v6 = vrot.slane %v609_v0, %v2986_v59  ;;  %v632_v7 = vrot.slane %v610_v2, %v2986_v59  ;;  %v640_v8 = vcombine.high %v618_v3, %v618_v3  ;;  %653 = vst.msk [vmem:[#allocation13] sm:$0x1] %vm652_vm12, %v618_v3 }
 0x44a   :  { %v639_v9 = vrot.slane %v611_v5, %v2986_v59  ;;  %v641_v10 = vcombine.high %v625_v6, %v625_v6  ;;  %v642_v11 = vcombine.high %v632_v7, %v632_v7  ;;  %654 = vst.msk [vmem:[#allocation13 + $0x2] sm:$0x1] %vm652_vm12, %v632_v7  ;;  %655 = vst.msk [vmem:[#allocation13 + $0x4] sm:$0x1] %vm652_vm12, %v640_v8 }
 0x44b   :  { %657 = vst.msk [vmem:[#allocation13 + $0x8] sm:$0x1] %vm652_vm12, %v625_v6 }
 0x44c   :  { %v643_v12 = vcombine.high %v639_v9, %v639_v9  ;;  %656 = vst.msk [vmem:[#allocation13 + $0x6] sm:$0x1] %vm652_vm12, %v642_v11  ;;  %658 = vst.msk [vmem:[#allocation13 + $0xa] sm:$0x1] %vm652_vm12, %v639_v9 }
 0x44d   :  { %659 = vst.msk [vmem:[#allocation13 + $0xc] sm:$0x1] %vm652_vm12, %v641_v10 }
 0x44e   :  { %660 = vst.msk [vmem:[#allocation13 + $0xe] sm:$0x1] %vm652_vm12, %v643_v12 }
 0x4be   :  { %v768_v13 = vpop.f32.mrb[12].mxu0 }
 0x4bf   :  { %v775_v14 = vcombine.high %v768_v13, %v768_v13  ;;  %v782_v15 = vrot.slane %v768_v13, %v2986_v59  ;;  %v2319_v16 = vpop.f32.mrb[13].mxu0 }
 0x4c0   :  { %v771_v18 = vpop.f32.mrb[14].mxu0 }
 0x4c1   :  { %v789_v19 = vrot.slane %v775_v14, %v2986_v59  ;;  %v790_v20 = vcombine.high %v782_v15, %v782_v15  ;;  %v2320_v21 = vpop.f32.mrb[15].mxu0  ;;  %v798_v22 = vrot.slane %v782_v15, %v2986_v59 }
 0x4c3   :  { %v827_v23 = vrot.slane %v798_v22, %v3003_v17  ;;  %v812_v24 = vrot.slane %v790_v20, %v2986_v59  ;;  %v820_v25 = vcombine.high %v798_v22, %v798_v22  ;;  %v791_v28 = vcombine.high %v789_v19, %v789_v19 }
 0x4c4   :  { %v805_v32 = vrot.slane %v789_v19, %v2986_v59 }
 0x4c5   :  { %856 = vrot.lane.b32.xlu0 %v827_v23, %s2614_s9  ;;  %v831_v26 = vrot.slane %v812_v24, %v3003_v17  ;;  %v822_v27 = vcombine.high %v812_v24, %v812_v24  ;;  %v835_v31 = vrot.slane %v820_v25, %v3003_v17  ;;  %v819_v37 = vrot.slane %v791_v28, %v2986_v59 }
 0x4c6   :  { %v993_v29 = vpop.f32.mrb[16].mxu0  ;;  %v843_v38 = vrot.slane %v805_v32, %v3003_v17  ;;  %v821_v39 = vcombine.high %v805_v32, %v805_v32 }
 0x4c7   :  { %858 = vrot.lane.b32.xlu1 %v831_v26, %s2614_s9  ;;  %v2331_v30 = vpop.f32.mrb[17].mxu0  ;;  %v1007_v34 = vrot.slane %v993_v29, %v2986_v59  ;;  %v839_v36 = vrot.slane %v822_v27, %v3003_v17  ;;  %v1000_v40 = vcombine.high %v993_v29, %v993_v29  ;;  %v847_v42 = vrot.slane %v819_v37, %v3003_v17 }
 0x4c8   :  { %v996_v33 = vpop.f32.mrb[18].mxu0  ;;  %v823_v43 = vcombine.high %v819_v37, %v819_v37  ;;  %v851_v46 = vrot.slane %v821_v39, %v3003_v17 }
 0x4c9   :  { %860 = vrot.lane.b32.xlu0 %v835_v31, %s2614_s9  ;;  %v2332_v35 = vpop.f32.mrb[19].mxu0  ;;  %v1015_v41 = vcombine.high %v1007_v34, %v1007_v34  ;;  %v1023_v47 = vrot.slane %v1007_v34, %v2986_v59  ;;  %v1014_v49 = vrot.slane %v1000_v40, %v2986_v59 }
 0x4ca   :  { %v855_v51 = vrot.slane %v823_v43, %v3003_v17 }
 0x4cb   :  { %862 = vrot.lane.b32.xlu1 %v839_v36, %s2614_s9  ;;  %v1037_v52 = vrot.slane %v1015_v41, %v2986_v59  ;;  %v1052_v53 = vrot.slane %v1023_v47, %v3003_v17  ;;  %v1045_v54 = vcombine.high %v1023_v47, %v1023_v47  ;;  %v1016_v57 = vcombine.high %v1014_v49, %v1014_v49 }
 0x4cc   :  { %v1030_v60 = vrot.slane %v1014_v49, %v2986_v59 }
 0x4cd   :  { %864 = vrot.lane.b32.xlu0 %v843_v38, %s2614_s9  ;;  %v1056_v55 = vrot.slane %v1037_v52, %v3003_v17  ;;  %v1047_v56 = vcombine.high %v1037_v52, %v1037_v52  ;;  %v1060_v58 = vrot.slane %v1045_v54, %v3003_v17  ;;  %v1044_v63 = vrot.slane %v1016_v57, %v2986_v59 }
 0x4ce   :  { %v1218_v45 = vpop.f32.mrb[20].mxu0  ;;  %v1068_v1 = vrot.slane %v1030_v60, %v3003_v17  ;;  %v1046_v0 = vcombine.high %v1030_v60, %v1030_v60 }
 0x4cf   :  { %866 = vrot.lane.b32.xlu1 %v847_v42, %s2614_s9  ;;  %v2343_v44 = vpop.f32.mrb[21].mxu0  ;;  %v1232_v61 = vrot.slane %v1218_v45, %v2986_v59  ;;  %v1064_v62 = vrot.slane %v1047_v56, %v3003_v17  ;;  %v1225_v2 = vcombine.high %v1218_v45, %v1218_v45  ;;  %v1072_v4 = vrot.slane %v1044_v63, %v3003_v17 }
 0x4d0   :  { %v1221_v48 = vpop.f32.mrb[22].mxu0  ;;  %v1048_v5 = vcombine.high %v1044_v63, %v1044_v63  ;;  %v1076_v7 = vrot.slane %v1046_v0, %v3003_v17 }
 0x4d1   :  { %868 = vrot.lane.b32.xlu0 %v851_v46, %s2614_s9  ;;  %v2344_v50 = vpop.f32.mrb[23].mxu0  ;;  %v1240_v3 = vcombine.high %v1232_v61, %v1232_v61  ;;  %v1248_v6 = vrot.slane %v1232_v61, %v2986_v59  ;;  %v1239_v8 = vrot.slane %v1225_v2, %v2986_v59 }
 0x4d2   :  { %v1080_v10 = vrot.slane %v1048_v5, %v3003_v17 }
 0x4d3   :  { %870 = vrot.lane.b32.xlu1 %v855_v51, %s2614_s9  ;;  %v1262_v9 = vrot.slane %v1240_v3, %v2986_v59  ;;  %v1270_v11 = vcombine.high %v1248_v6, %v1248_v6  ;;  %v1277_v12 = vrot.slane %v1248_v6, %v3003_v17  ;;  %v1241_v13 = vcombine.high %v1239_v8, %v1239_v8 }
 0x4d4   :  { %v1255_v16 = vrot.slane %v1239_v8, %v2986_v59 }
 0x4d5   :  { %1081 = vrot.lane.b32.xlu0 %v1052_v53, %s2616_s1  ;;  %v1281_v14 = vrot.slane %v1262_v9, %v3003_v17  ;;  %v1272_v15 = vcombine.high %v1262_v9, %v1262_v9  ;;  %v1285_v18 = vrot.slane %v1270_v11, %v3003_v17  ;;  %v1269_v20 = vrot.slane %v1241_v13, %v2986_v59 }
 0x4d6   :  { %v1293_v21 = vrot.slane %v1255_v16, %v3003_v17  ;;  %v1271_v22 = vcombine.high %v1255_v16, %v1255_v16 }
 0x4d7   :  { %1083 = vrot.lane.b32.xlu1 %v1056_v55, %s2616_s1  ;;  %v1289_v19 = vrot.slane %v1272_v15, %v3003_v17  ;;  %v1297_v23 = vrot.slane %v1269_v20, %v3003_v17  ;;  %v1273_v24 = vcombine.high %v1269_v20, %v1269_v20 }
 0x4d8   :  { %v1301_v25 = vrot.slane %v1271_v22, %v3003_v17 }
 0x4d9   :  { %1085 = vrot.lane.b32.xlu0 %v1060_v58, %s2616_s1  ;;  %v1305_v26 = vrot.slane %v1273_v24, %v3003_v17 }
 0x4db   :  { %1087 = vrot.lane.b32.xlu1 %v1064_v62, %s2616_s1 }
 0x4dd   :  { %1089 = vrot.lane.b32.xlu0 %v1068_v1, %s2616_s1 }
 0x4df   :  { %1091 = vrot.lane.b32.xlu1 %v1072_v4, %s2616_s1 }
 0x4e1   :  { %1093 = vrot.lane.b32.xlu0 %v1076_v7, %s2616_s1 }
 0x4e3   :  { %1095 = vrot.lane.b32.xlu1 %v1080_v10, %s2616_s1 }
 0x4e5   :  { %1306 = vrot.lane.b32.xlu0 %v1277_v12, %s2624_s5 }
 0x4e7   :  { %1308 = vrot.lane.b32.xlu1 %v1281_v14, %s2624_s5 }
 0x4e9   :  { %1310 = vrot.lane.b32.xlu0 %v1285_v18, %s2624_s5 }
 0x4eb   :  { %1312 = vrot.lane.b32.xlu1 %v1289_v19, %s2624_s5 }
 0x4ed   :  { %1314 = vrot.lane.b32.xlu0 %v1293_v21, %s2624_s5 }
 0x4ef   :  { %1316 = vrot.lane.b32.xlu1 %v1297_v23, %s2624_s5 }
 0x4f1   :  { %1318 = vrot.lane.b32.xlu0 %v1301_v25, %s2624_s5 }
 0x4f3   :  { %1320 = vrot.lane.b32.xlu1 %v1305_v26, %s2624_s5 }
 0x4f6   :  { %v1440_v27 = vpop.f32.mrb[24].mxu0 }
 0x4f7   :  { %v1447_v28 = vcombine.high %v1440_v27, %v1440_v27  ;;  %v1454_v29 = vrot.slane %v1440_v27, %v2986_v59  ;;  %v2355_v30 = vpop.f32.mrb[25].mxu0 }
 0x4f8   :  { %v1443_v31 = vpop.f32.mrb[26].mxu0 }
 0x4f9   :  { %v1461_v32 = vrot.slane %v1447_v28, %v2986_v59  ;;  %v1462_v33 = vcombine.high %v1454_v29, %v1454_v29  ;;  %v1470_v34 = vrot.slane %v1454_v29, %v2986_v59  ;;  %v2356_v35 = vpop.f32.mrb[27].mxu0 }
 0x4fb   :  { %v1463_v36 = vcombine.high %v1461_v32, %v1461_v32  ;;  %v1477_v37 = vrot.slane %v1461_v32, %v2986_v59  ;;  %v1484_v38 = vrot.slane %v1462_v33, %v2986_v59  ;;  %v1492_v39 = vcombine.high %v1470_v34, %v1470_v34  ;;  %1504 = vst.msk [vmem:[#allocation13 + $0x1] sm:$0x1] %vm652_vm12, %v1470_v34 }
 0x4fd   :  { %v1491_v40 = vrot.slane %v1463_v36, %v2986_v59  ;;  %v1493_v41 = vcombine.high %v1477_v37, %v1477_v37  ;;  %v1494_v42 = vcombine.high %v1484_v38, %v1484_v38  ;;  %1505 = vst.msk [vmem:[#allocation13 + $0x3] sm:$0x1] %vm652_vm12, %v1484_v38  ;;  %1506 = vst.msk [vmem:[#allocation13 + $0x5] sm:$0x1] %vm652_vm12, %v1492_v39 }
 0x4fe   :  { %1508 = vst.msk [vmem:[#allocation13 + $0x9] sm:$0x1] %vm652_vm12, %v1477_v37  ;;  %v1619_v43 = vpop.f32.mrb[28].mxu0 }
 0x4ff   :  { %v1495_v45 = vcombine.high %v1491_v40, %v1491_v40  ;;  %v1626_v44 = vcombine.high %v1619_v43, %v1619_v43  ;;  %v1633_v46 = vrot.slane %v1619_v43, %v2986_v59  ;;  %v2367_v47 = vpop.f32.mrb[29].mxu0  ;;  %1507 = vst.msk [vmem:[#allocation13 + $0x7] sm:$0x1] %vm652_vm12, %v1494_v42  ;;  %1509 = vst.msk [vmem:[#allocation13 + $0xb] sm:$0x1] %vm652_vm12, %v1491_v40 }
 0x500   :  { %1510 = vst.msk [vmem:[#allocation13 + $0xd] sm:$0x1] %vm652_vm12, %v1493_v41  ;;  %v1622_v48 = vpop.f32.mrb[30].mxu0 }
 0x501   :  { %v1640_v49 = vrot.slane %v1626_v44, %v2986_v59  ;;  %v1641_v50 = vcombine.high %v1633_v46, %v1633_v46  ;;  %v2368_v51 = vpop.f32.mrb[31].mxu0  ;;  %v1649_v52 = vrot.slane %v1633_v46, %v2986_v59  ;;  %1511 = vst.msk [vmem:[#allocation13 + $0xf] sm:$0x1] %vm652_vm12, %v1495_v45 }
 0x503   :  { %v1678_v53 = vrot.slane %v1649_v52, %v3003_v17  ;;  %v1663_v54 = vrot.slane %v1641_v50, %v2986_v59  ;;  %v1671_v55 = vcombine.high %v1649_v52, %v1649_v52  ;;  %v1642_v58 = vcombine.high %v1640_v49, %v1640_v49 }
 0x504   :  { %v1656_v63 = vrot.slane %v1640_v49, %v2986_v59 }
 0x505   :  { %1707 = vrot.lane.b32.xlu0 %v1678_v53, %s2614_s9  ;;  %v1682_v56 = vrot.slane %v1663_v54, %v3003_v17  ;;  %v1673_v57 = vcombine.high %v1663_v54, %v1663_v54  ;;  %v1686_v62 = vrot.slane %v1671_v55, %v3003_v17  ;;  %v1670_v4 = vrot.slane %v1642_v58, %v2986_v59 }
 0x506   :  { %v1843_v60 = vpop.f32.mrb[32].mxu0  ;;  %v1694_v5 = vrot.slane %v1656_v63, %v3003_v17  ;;  %v1672_v6 = vcombine.high %v1656_v63, %v1656_v63 }
 0x507   :  { %1709 = vrot.lane.b32.xlu1 %v1682_v56, %s2614_s9  ;;  %v2379_v61 = vpop.f32.mrb[33].mxu0  ;;  %v1857_v0 = vrot.slane %v1843_v60, %v2986_v59  ;;  %v1690_v3 = vrot.slane %v1673_v57, %v3003_v17  ;;  %v1850_v7 = vcombine.high %v1843_v60, %v1843_v60  ;;  %v1698_v9 = vrot.slane %v1670_v4, %v3003_v17 }
 0x508   :  { %v1846_v1 = vpop.f32.mrb[34].mxu0  ;;  %v1674_v10 = vcombine.high %v1670_v4, %v1670_v4  ;;  %v1702_v13 = vrot.slane %v1672_v6, %v3003_v17 }
 0x509   :  { %1711 = vrot.lane.b32.xlu0 %v1686_v62, %s2614_s9  ;;  %v2380_v2 = vpop.f32.mrb[35].mxu0  ;;  %v1865_v8 = vcombine.high %v1857_v0, %v1857_v0  ;;  %v1873_v14 = vrot.slane %v1857_v0, %v2986_v59  ;;  %v1864_v16 = vrot.slane %v1850_v7, %v2986_v59 }
 0x50a   :  { %v1706_v19 = vrot.slane %v1674_v10, %v3003_v17 }
 0x50b   :  { %1713 = vrot.lane.b32.xlu1 %v1690_v3, %s2614_s9  ;;  %v1887_v20 = vrot.slane %v1865_v8, %v2986_v59  ;;  %v1902_v21 = vrot.slane %v1873_v14, %v3003_v17  ;;  %v1895_v22 = vcombine.high %v1873_v14, %v1873_v14  ;;  %v1866_v25 = vcombine.high %v1864_v16, %v1864_v16 }
 0x50c   :  { %v1880_v27 = vrot.slane %v1864_v16, %v2986_v59 }
 0x50d   :  { %1715 = vrot.lane.b32.xlu0 %v1694_v5, %s2614_s9  ;;  %v1906_v23 = vrot.slane %v1887_v20, %v3003_v17  ;;  %v1897_v24 = vcombine.high %v1887_v20, %v1887_v20  ;;  %v1910_v26 = vrot.slane %v1895_v22, %v3003_v17  ;;  %v1894_v30 = vrot.slane %v1866_v25, %v2986_v59 }
 0x50e   :  { %v2067_v11 = vpop.f32.mrb[36].mxu0  ;;  %v1918_v31 = vrot.slane %v1880_v27, %v3003_v17  ;;  %v1896_v32 = vcombine.high %v1880_v27, %v1880_v27 }
 0x50f   :  { %1717 = vrot.lane.b32.xlu1 %v1698_v9, %s2614_s9  ;;  %v2391_v12 = vpop.f32.mrb[37].mxu0  ;;  %v2081_v28 = vrot.slane %v2067_v11, %v2986_v59  ;;  %v1914_v29 = vrot.slane %v1897_v24, %v3003_v17  ;;  %v2074_v33 = vcombine.high %v2067_v11, %v2067_v11  ;;  %v1922_v35 = vrot.slane %v1894_v30, %v3003_v17 }
 0x510   :  { %v2070_v15 = vpop.f32.mrb[38].mxu0  ;;  %v1898_v36 = vcombine.high %v1894_v30, %v1894_v30  ;;  %v1926_v38 = vrot.slane %v1896_v32, %v3003_v17 }
 0x511   :  { %1719 = vrot.lane.b32.xlu0 %v1702_v13, %s2614_s9  ;;  %v2392_v18 = vpop.f32.mrb[39].mxu0  ;;  %v2089_v34 = vcombine.high %v2081_v28, %v2081_v28  ;;  %v2097_v37 = vrot.slane %v2081_v28, %v2986_v59  ;;  %v2088_v39 = vrot.slane %v2074_v33, %v2986_v59 }
 0x512   :  { %v1930_v41 = vrot.slane %v1898_v36, %v3003_v17 }
 0x513   :  { %1721 = vrot.lane.b32.xlu1 %v1706_v19, %s2614_s9  ;;  %v2111_v40 = vrot.slane %v2089_v34, %v2986_v59  ;;  %v2119_v42 = vcombine.high %v2097_v37, %v2097_v37  ;;  %v2126_v43 = vrot.slane %v2097_v37, %v3003_v17  ;;  %v2090_v45 = vcombine.high %v2088_v39, %v2088_v39 }
 0x514   :  { %v2104_v47 = vrot.slane %v2088_v39, %v2986_v59 }
 0x515   :  { %1931 = vrot.lane.b32.xlu0 %v1902_v21, %s2616_s1  ;;  %v2130_v44 = vrot.slane %v2111_v40, %v3003_v17  ;;  %v2121_v46 = vcombine.high %v2111_v40, %v2111_v40  ;;  %v2134_v48 = vrot.slane %v2119_v42, %v3003_v17  ;;  %v2118_v50 = vrot.slane %v2090_v45, %v2986_v59 }
 0x516   :  { %v2142_v51 = vrot.slane %v2104_v47, %v3003_v17  ;;  %v2120_v52 = vcombine.high %v2104_v47, %v2104_v47 }
 0x517   :  { %1933 = vrot.lane.b32.xlu1 %v1906_v23, %s2616_s1  ;;  %v2138_v49 = vrot.slane %v2121_v46, %v3003_v17  ;;  %v2146_v53 = vrot.slane %v2118_v50, %v3003_v17  ;;  %v2122_v54 = vcombine.high %v2118_v50, %v2118_v50 }
 0x518   :  { %v2150_v55 = vrot.slane %v2120_v52, %v3003_v17 }
 0x519   :  { %1935 = vrot.lane.b32.xlu0 %v1910_v26, %s2616_s1  ;;  %v2154_v56 = vrot.slane %v2122_v54, %v3003_v17 }
 0x51b   :  { %1937 = vrot.lane.b32.xlu1 %v1914_v29, %s2616_s1 }
 0x51d   :  { %1939 = vrot.lane.b32.xlu0 %v1918_v31, %s2616_s1 }
 0x51f   :  { %1941 = vrot.lane.b32.xlu1 %v1922_v35, %s2616_s1 }
 0x521   :  { %1943 = vrot.lane.b32.xlu0 %v1926_v38, %s2616_s1 }
 0x523   :  { %1945 = vrot.lane.b32.xlu1 %v1930_v41, %s2616_s1  ;;  %s2628_s1 = smov [#allocation13]  }
 0x524   :  { %s2192_s26 = sshll.u32 %s2628_s1, 4  ;;  %s2193_s26 = int_to_ptr.vmem [resolvable:$true] %s2192_s26 }
 0x525   :  { %2155 = vrot.lane.b32.xlu0 %v2126_v43, %s2624_s5  ;;  %s2580_s27 = scalar_lea.vmem %s2193_s26, 256  ;;  %p2585_p7 = scmp.lt.s32.totalorder %s2193_s26, %s2193_s26 }
 0x526   :  { %p2581_p6 = scmp.ne.s32.totalorder %s2193_s26, %s2580_s27  ;;  %p2586_p8 = scmp.lt.s32.totalorder %s2580_s27, %s2580_s27 }
 0x527   :  { %2157 = vrot.lane.b32.xlu1 %v2130_v44, %s2624_s5 }
 0x528   :  { %p2587_p9 = por %p2586_p8, %p2585_p7 }
 0x529   :  { %2159 = vrot.lane.b32.xlu0 %v2134_v48, %s2624_s5 }
 0x52a   :  { %p2588_p10 = pnand %p2587_p9, %p2581_p6 }
 0x52b   :  { %2161 = vrot.lane.b32.xlu1 %v2138_v49, %s2624_s5 }
 0x52d   :  { %2163 = vrot.lane.b32.xlu0 %v2142_v51, %s2624_s5 }
 0x52f   :  { %2165 = vrot.lane.b32.xlu1 %v2146_v53, %s2624_s5 }
 0x531   :  { %2167 = vrot.lane.b32.xlu0 %v2150_v55, %s2624_s5 }
 0x533   :  { %2169 = vrot.lane.b32.xlu1 %v2154_v56, %s2624_s5 }
 0x537   :  { %v857_v59 = vpop.permute.xlu0 %856 }
 0x538   :  { %881 = vst.msk [vmem:[#allocation13] sm:$0x1] %vm880_vm13, %v857_v59 }
 0x539   :  { %v859_v57 = vpop.permute.xlu1 %858 }
 0x53a   :  { %882 = vst.msk [vmem:[#allocation13 + $0x2] sm:$0x1] %vm880_vm13, %v859_v57 }
 0x53b   :  { %v861_v58 = vpop.permute.xlu0 %860 }
 0x53c   :  { %883 = vst.msk [vmem:[#allocation13 + $0x4] sm:$0x1] %vm880_vm13, %v861_v58 }
 0x53d   :  { %v863_v60 = vpop.permute.xlu1 %862 }
 0x53e   :  { %884 = vst.msk [vmem:[#allocation13 + $0x6] sm:$0x1] %vm880_vm13, %v863_v60 }
 0x53f   :  { %v865_v61 = vpop.permute.xlu0 %864 }
 0x540   :  { %885 = vst.msk [vmem:[#allocation13 + $0x8] sm:$0x1] %vm880_vm13, %v865_v61 }
 0x541   :  { %v867_v62 = vpop.permute.xlu1 %866 }
 0x542   :  { %886 = vst.msk [vmem:[#allocation13 + $0xa] sm:$0x1] %vm880_vm13, %v867_v62 }
 0x543   :  { %v869_v17 = vpop.permute.xlu0 %868 }
 0x544   :  { %887 = vst.msk [vmem:[#allocation13 + $0xc] sm:$0x1] %vm880_vm13, %v869_v17 }
 0x545   :  { %v871_v63 = vpop.permute.xlu1 %870 }
 0x546   :  { %888 = vst.msk [vmem:[#allocation13 + $0xe] sm:$0x1] %vm880_vm13, %v871_v63 }
 0x547   :  { %v1082_v1 = vpop.permute.xlu0 %1081 }
 0x548   :  { %1106 = vst.msk [vmem:[#allocation13] sm:$0x1] %vm1105_vm14, %v1082_v1 }
 0x549   :  { %v1084_v0 = vpop.permute.xlu1 %1083 }
 0x54a   :  { %1107 = vst.msk [vmem:[#allocation13 + $0x2] sm:$0x1] %vm1105_vm14, %v1084_v0 }
 0x54b   :  { %v1086_v2 = vpop.permute.xlu0 %1085 }
 0x54c   :  { %1108 = vst.msk [vmem:[#allocation13 + $0x4] sm:$0x1] %vm1105_vm14, %v1086_v2 }
 0x54d   :  { %v1088_v3 = vpop.permute.xlu1 %1087 }
 0x54e   :  { %1109 = vst.msk [vmem:[#allocation13 + $0x6] sm:$0x1] %vm1105_vm14, %v1088_v3 }
 0x54f   :  { %v1090_v4 = vpop.permute.xlu0 %1089 }
 0x550   :  { %1110 = vst.msk [vmem:[#allocation13 + $0x8] sm:$0x1] %vm1105_vm14, %v1090_v4 }
 0x551   :  { %v1092_v5 = vpop.permute.xlu1 %1091 }
 0x552   :  { %1111 = vst.msk [vmem:[#allocation13 + $0xa] sm:$0x1] %vm1105_vm14, %v1092_v5 }
 0x553   :  { %v1094_v6 = vpop.permute.xlu0 %1093 }
 0x554   :  { %1112 = vst.msk [vmem:[#allocation13 + $0xc] sm:$0x1] %vm1105_vm14, %v1094_v6 }
 0x555   :  { %v1096_v7 = vpop.permute.xlu1 %1095 }
 0x556   :  { %1113 = vst.msk [vmem:[#allocation13 + $0xe] sm:$0x1] %vm1105_vm14, %v1096_v7 }
 0x557   :  { %v1307_v8 = vpop.permute.xlu0 %1306 }
 0x558   :  { %1331 = vst.msk [vmem:[#allocation13] sm:$0x1] %vm1330_vm15, %v1307_v8 }
 0x559   :  { %v1309_v9 = vpop.permute.xlu1 %1308 }
 0x55a   :  { %1332 = vst.msk [vmem:[#allocation13 + $0x2] sm:$0x1] %vm1330_vm15, %v1309_v9 }
 0x55b   :  { %v1311_v10 = vpop.permute.xlu0 %1310 }
 0x55c   :  { %1333 = vst.msk [vmem:[#allocation13 + $0x4] sm:$0x1] %vm1330_vm15, %v1311_v10 }
 0x55d   :  { %v1313_v11 = vpop.permute.xlu1 %1312 }
 0x55e   :  { %1334 = vst.msk [vmem:[#allocation13 + $0x6] sm:$0x1] %vm1330_vm15, %v1313_v11 }
 0x55f   :  { %v1315_v12 = vpop.permute.xlu0 %1314 }
 0x560   :  { %1335 = vst.msk [vmem:[#allocation13 + $0x8] sm:$0x1] %vm1330_vm15, %v1315_v12 }
 0x561   :  { %v1317_v13 = vpop.permute.xlu1 %1316 }
 0x562   :  { %1336 = vst.msk [vmem:[#allocation13 + $0xa] sm:$0x1] %vm1330_vm15, %v1317_v13 }
 0x563   :  { %v1319_v14 = vpop.permute.xlu0 %1318 }
 0x564   :  { %1337 = vst.msk [vmem:[#allocation13 + $0xc] sm:$0x1] %vm1330_vm15, %v1319_v14 }
 0x565   :  { %v1321_v15 = vpop.permute.xlu1 %1320 }
 0x566   :  { %1338 = vst.msk [vmem:[#allocation13 + $0xe] sm:$0x1] %vm1330_vm15, %v1321_v15 }
 0x577   :  { %v1708_v16 = vpop.permute.xlu0 %1707 }
 0x578   :  { %1731 = vst.msk [vmem:[#allocation13 + $0x1] sm:$0x1] %vm880_vm13, %v1708_v16 }
 0x579   :  { %v1710_v18 = vpop.permute.xlu1 %1709 }
 0x57a   :  { %1732 = vst.msk [vmem:[#allocation13 + $0x3] sm:$0x1] %vm880_vm13, %v1710_v18 }
 0x57b   :  { %v1712_v19 = vpop.permute.xlu0 %1711 }
 0x57c   :  { %1733 = vst.msk [vmem:[#allocation13 + $0x5] sm:$0x1] %vm880_vm13, %v1712_v19 }
 0x57d   :  { %v1714_v20 = vpop.permute.xlu1 %1713 }
 0x57e   :  { %1734 = vst.msk [vmem:[#allocation13 + $0x7] sm:$0x1] %vm880_vm13, %v1714_v20 }
 0x57f   :  { %v1716_v21 = vpop.permute.xlu0 %1715 }
 0x580   :  { %1735 = vst.msk [vmem:[#allocation13 + $0x9] sm:$0x1] %vm880_vm13, %v1716_v21 }
 0x581   :  { %v1718_v22 = vpop.permute.xlu1 %1717 }
 0x582   :  { %1736 = vst.msk [vmem:[#allocation13 + $0xb] sm:$0x1] %vm880_vm13, %v1718_v22 }
 0x583   :  { %v1720_v23 = vpop.permute.xlu0 %1719 }
 0x584   :  { %1737 = vst.msk [vmem:[#allocation13 + $0xd] sm:$0x1] %vm880_vm13, %v1720_v23 }
 0x585   :  { %v1722_v24 = vpop.permute.xlu1 %1721 }
 0x586   :  { %1738 = vst.msk [vmem:[#allocation13 + $0xf] sm:$0x1] %vm880_vm13, %v1722_v24 }
 0x587   :  { %v1932_v25 = vpop.permute.xlu0 %1931 }
 0x588   :  { %1955 = vst.msk [vmem:[#allocation13 + $0x1] sm:$0x1] %vm1105_vm14, %v1932_v25 }
 0x589   :  { %v1934_v26 = vpop.permute.xlu1 %1933 }
 0x58a   :  { %1956 = vst.msk [vmem:[#allocation13 + $0x3] sm:$0x1] %vm1105_vm14, %v1934_v26 }
 0x58b   :  { %v1936_v27 = vpop.permute.xlu0 %1935 }
 0x58c   :  { %1957 = vst.msk [vmem:[#allocation13 + $0x5] sm:$0x1] %vm1105_vm14, %v1936_v27 }
 0x58d   :  { %v1938_v28 = vpop.permute.xlu1 %1937 }
 0x58e   :  { %1958 = vst.msk [vmem:[#allocation13 + $0x7] sm:$0x1] %vm1105_vm14, %v1938_v28 }
 0x58f   :  { %v1940_v29 = vpop.permute.xlu0 %1939 }
 0x590   :  { %1959 = vst.msk [vmem:[#allocation13 + $0x9] sm:$0x1] %vm1105_vm14, %v1940_v29 }
 0x591   :  { %v1942_v30 = vpop.permute.xlu1 %1941 }
 0x592   :  { %1960 = vst.msk [vmem:[#allocation13 + $0xb] sm:$0x1] %vm1105_vm14, %v1942_v30 }
 0x593   :  { %v1944_v31 = vpop.permute.xlu0 %1943 }
 0x594   :  { %1961 = vst.msk [vmem:[#allocation13 + $0xd] sm:$0x1] %vm1105_vm14, %v1944_v31 }
 0x595   :  { %v1946_v32 = vpop.permute.xlu1 %1945 }
 0x596   :  { %1962 = vst.msk [vmem:[#allocation13 + $0xf] sm:$0x1] %vm1105_vm14, %v1946_v32 }
 0x597   :  { %v2156_v33 = vpop.permute.xlu0 %2155 }
 0x598   :  { %2179 = vst.msk [vmem:[#allocation13 + $0x1] sm:$0x1] %vm1330_vm15, %v2156_v33 }
 0x599   :  { %v2158_v34 = vpop.permute.xlu1 %2157 }
 0x59a   :  { %2180 = vst.msk [vmem:[#allocation13 + $0x3] sm:$0x1] %vm1330_vm15, %v2158_v34 }
 0x59b   :  { %v2160_v35 = vpop.permute.xlu0 %2159 }
 0x59c   :  { %2181 = vst.msk [vmem:[#allocation13 + $0x5] sm:$0x1] %vm1330_vm15, %v2160_v35 }
 0x59d   :  { %v2162_v36 = vpop.permute.xlu1 %2161 }
 0x59e   :  { %2182 = vst.msk [vmem:[#allocation13 + $0x7] sm:$0x1] %vm1330_vm15, %v2162_v36 }
 0x59f   :  { %v2164_v37 = vpop.permute.xlu0 %2163 }
 0x5a0   :  { %2183 = vst.msk [vmem:[#allocation13 + $0x9] sm:$0x1] %vm1330_vm15, %v2164_v37 }
 0x5a1   :  { %v2166_v38 = vpop.permute.xlu1 %2165 }
 0x5a2   :  { %2184 = vst.msk [vmem:[#allocation13 + $0xb] sm:$0x1] %vm1330_vm15, %v2166_v38 }
 0x5a3   :  { %v2168_v39 = vpop.permute.xlu0 %2167 }
 0x5a4   :  { %2185 = vst.msk [vmem:[#allocation13 + $0xd] sm:$0x1] %vm1330_vm15, %v2168_v39 }
 0x5a5   :  { %v2170_v40 = vpop.permute.xlu1 %2169 }
 0x5a6   :  { %2186 = vst.msk [vmem:[#allocation13 + $0xf] sm:$0x1] %vm1330_vm15, %v2170_v40 }
 0x5a7   :  { %2591 = shalt.err (!%p2588_p10)
}
 0x5a8   :  { %s2592_s7 = scalar_lea.hbm %s3219_s6, 256 }
 0x5a9   :  { %p2593_p11 = scmp.ne.s32.totalorder %s3219_s6, %s2592_s7  ;;  %p2596_p12 = scmp.lt.u32.totalorder %s2592_s7, %s3219_s6 }
 0x5ab   :  { %p2598_p13 = pnand %p2596_p12, %p2593_p11 }
 0x5ad   :  { %2601 = shalt.err (!%p2598_p13)
}
 0x5ae   :  { %2198 = dma.vmem_to_hbm [thread:$0]  %s2193_s26, 256, %s3219_s6, [#allocation4], %s2614_s9, %s2614_s9, %s2615_s10  }
 0x5af   :  { %2610 = dma.done.wait [#allocation4], 256  }
 0x5b0   :  { %2611 = vsyncadd [#allocation4], 4294967040 }
 0x5b1   :  { %2202 = vsyncpa [#allocation3], 1 }
 0x5b2   :  { %2203 = vsyncpa [#allocation6], 1 }
 0x5b3   :  { %2204 = vsyncpa [#allocation9], 1 }
 0x5b4   :  { %2205 = vsyncpa [#allocation12], 1 }
 0x5b5   :  { %2206 = vsyncpa [#allocation4], 1 }

</bundles_post_ra>
